<compile_context>
chip_gen: v7x
topology: tpu7x:2x2x1
jax: 0.10.0
libtpu: 0.0.40
codegen_flags: <defaults>
</compile_context>

<pallas_src>
import jax
import jax.numpy as jnp
from jax.experimental import pallas as pl
from jax.experimental.pallas import tpu as pltpu


# ----------------------------- Pallas kernels ------------------------------

def _conv_relu_pool_kernel(r_ref, w_ref, b_ref, o_ref):
    """Fused Conv2d(3x3, pad=1) + bias + ReLU + MaxPool2d(2) on one column tile.

    r_ref: (4, 9*Cin, tm) bf16  pool-parity im2col columns (tm pooled pixels)
    w_ref: (Cout, 9*Cin)  bf16  flattened conv weight
    b_ref: (Cout, 1)      f32   bias
    o_ref: (Cout, tm)     f32   pooled + ReLU'd output (lane-dense)
    """
    w = w_ref[...]
    # One MXU matmul per pool parity, full K = 9*Cin contraction, f32 acc.
    y0 = jnp.dot(w, r_ref[0], preferred_element_type=jnp.float32)
    y1 = jnp.dot(w, r_ref[1], preferred_element_type=jnp.float32)
    y2 = jnp.dot(w, r_ref[2], preferred_element_type=jnp.float32)
    y3 = jnp.dot(w, r_ref[3], preferred_element_type=jnp.float32)
    # MaxPool2d(2): elementwise max over the four parities (max/ReLU/bias commute).
    p = jnp.maximum(jnp.maximum(y0, y1), jnp.maximum(y2, y3))
    o_ref[...] = jnp.maximum(p + b_ref[...], 0.0)


def _mlp_kernel(x_ref, w1_ref, b1_ref, w2_ref, b2_ref, o_ref, acc_ref):
    """Fused Linear(4096->256) + ReLU + Linear(256->num_classes).

    The Din contraction is split over grid axis 0 so the bf16 fc1 weight DMA
    is pipelined; the hidden activation lives only in the f32 VMEM accumulator.
    """
    k = pl.program_id(0)

    @pl.when(k == 0)
    def _():
        acc_ref[...] = jnp.zeros_like(acc_ref)

    acc_ref[...] += jnp.dot(x_ref[...].astype(jnp.bfloat16), w1_ref[...],
                            preferred_element_type=jnp.float32)

    @pl.when(k == pl.num_programs(0) - 1)
    def _():
        h = jnp.maximum(acc_ref[...] + b1_ref[...], 0.0)
        y = jnp.dot(h.astype(jnp.bfloat16), w2_ref[...],
                    preferred_element_type=jnp.float32)
        o_ref[...] = y + b2_ref[...]


# ------------------------------ JAX wrappers --------------------------------

def _pooled_im2col(xc):
    """Channel-major xc: (C, N, H, W) -> (4, 9*C, N*(H//2)*(W//2)) in bf16.

    Axis 0          = pool parity dy*2+dx
    Axis 1 index    = c*9 + (u*3 + v)              (matches weight flatten)
    Axis 2 (column) = n*H2*W2 + h2*W2 + w2         (lane-dense, batch folded in)
    Pure layout glue handled by XLA once per stage.
    """
    c, n, h, w = xc.shape
    h2, w2 = h // 2, w // 2
    xp = jnp.pad(xc, ((0, 0), (0, 0), (1, 1), (1, 1)))
    slabs = jnp.stack([xp[:, :, u:u + h, v:v + w]
                       for u in range(3) for v in range(3)], axis=1)  # (C,9,N,H,W)
    s = slabs.reshape(c, 9, n, h2, 2, w2, 2)        # h = 2*h2+dy, w = 2*w2+dx
    s = s.transpose(4, 6, 0, 1, 2, 3, 5)            # (dy, dx, C, tap, N, h2, w2)
    return s.reshape(4, 9 * c, n * h2 * w2).astype(jnp.bfloat16)


def _pick_tile(m):
    """Largest multiple-of-128 tile that divides the pooled-column count."""
    for tm in (2048, 1024, 512, 256, 128):
        if m % tm == 0:
            return tm
    return m


def conv_relu_pool(xc, w_flat, b_col):
    """xc: (Cin, N, H, W) channel-major; w_flat: (Cout, 9*Cin) bf16; b_col: (Cout, 1).
    Returns (Cout, N*(H//2)*(W//2)) f32 pooled activations (columns = n, h2, w2)."""
    cin, n, h, w = xc.shape
    cout = w_flat.shape[0]
    m = n * (h // 2) * (w // 2)
    r = _pooled_im2col(xc)                          # (4, 9*Cin, m) bf16
    tm = _pick_tile(m)
    return pl.pallas_call(
        _conv_relu_pool_kernel,
        out_shape=jax.ShapeDtypeStruct((cout, m), jnp.float32),
        grid=(m // tm,),
        in_specs=[
            pl.BlockSpec((4, 9 * cin, tm), lambda i: (0, 0, i)),
            pl.BlockSpec((cout, 9 * cin), lambda i: (0, 0)),
            pl.BlockSpec((cout, 1), lambda i: (0, 0)),
        ],
        out_specs=pl.BlockSpec((cout, tm), lambda i: (0, i)),
        compiler_params=pltpu.CompilerParams(dimension_semantics=("parallel",)),
    )(r, w_flat, b_col)


def mlp(f, w1, b1, w2, b2, *, kc=512):
    """f: (N, Din) f32; w1: (Din, Dh) bf16; b1: (1, Dh); w2: (Dh, Dout) bf16; b2: (1, Dout)."""
    n, din = f.shape
    dh = w1.shape[1]
    dout = w2.shape[1]
    assert din % kc == 0
    return pl.pallas_call(
        _mlp_kernel,
        out_shape=jax.ShapeDtypeStruct((n, dout), jnp.float32),
        grid=(din // kc,),
        in_specs=[
            pl.BlockSpec((n, kc), lambda k: (0, k)),
            pl.BlockSpec((kc, dh), lambda k: (k, 0)),
            pl.BlockSpec((1, dh), lambda k: (0, 0)),
            pl.BlockSpec((dh, dout), lambda k: (0, 0)),
            pl.BlockSpec((1, dout), lambda k: (0, 0)),
        ],
        out_specs=pl.BlockSpec((n, dout), lambda k: (0, 0)),
        scratch_shapes=[pltpu.VMEM((n, dh), jnp.float32)],
        compiler_params=pltpu.CompilerParams(dimension_semantics=("arbitrary",)),
    )(f, w1, b1, w2, b2)


def simple_cnn_forward(x, kp):
    n = x.shape[0]
    # Channel-major view of the input (tiny one-time transpose).
    xc = x.transpose(1, 0, 2, 3)                          # (3, N, 32, 32)
    # Stage 1: conv1 + ReLU + pool -> (32, N*16*16), columns = (n, h2, w2)
    a1 = conv_relu_pool(xc, kp["conv1_w"], kp["conv1_b"])
    # Already channel-major: no NCHW round trip before the second im2col.
    x2 = a1.reshape(32, n, 16, 16)
    # Stage 2: conv2 + ReLU + pool -> (64, N*8*8)
    a2 = conv_relu_pool(x2, kp["conv2_w"], kp["conv2_b"])
    # PyTorch NCHW flatten order (N, C*H*W) = (N, 4096), lane-dense for fc1.
    f = a2.reshape(64, n, 64).transpose(1, 0, 2).reshape(n, 64 * 64)
    # Stage 3: fc1 + ReLU + fc2 (bf16 weights, f32 accumulation, pipelined K).
    return mlp(f, kp["fc1_w"], kp["fc1_b"], kp["fc2_w"], kp["fc2_b"])


# --------------------------- params / reference -----------------------------

def init_params(key, num_classes=10):
    ks = jax.random.split(key, 8)

    def he(k, shape, fan_in):
        return jax.random.normal(k, shape, jnp.float32) * jnp.sqrt(2.0 / fan_in)

    return {
        "conv1_w": he(ks[0], (32, 3, 3, 3), 3 * 3 * 3),
        "conv1_b": jax.random.normal(ks[1], (32,), jnp.float32) * 0.01,
        "conv2_w": he(ks[2], (64, 32, 3, 3), 32 * 3 * 3),
        "conv2_b": jax.random.normal(ks[3], (64,), jnp.float32) * 0.01,
        "fc1_w":   he(ks[4], (256, 64 * 8 * 8), 64 * 8 * 8),
        "fc1_b":   jax.random.normal(ks[5], (256,), jnp.float32) * 0.01,
        "fc2_w":   he(ks[6], (num_classes, 256), 256),
        "fc2_b":   jax.random.normal(ks[7], (num_classes,), jnp.float32) * 0.01,
    }


def prepare_params(p):
    """One-time weight repack (outside the jitted forward):
    - flatten conv weights and store them (and the im2col) in bf16,
    - pre-transpose fc weights, store in bf16 (halves the fc1 weight DMA),
    - biases stay f32 (added after the f32 MXU accumulation)."""
    return {
        "conv1_w": p["conv1_w"].reshape(p["conv1_w"].shape[0], -1).astype(jnp.bfloat16),
        "conv1_b": p["conv1_b"].reshape(-1, 1).astype(jnp.float32),
        "conv2_w": p["conv2_w"].reshape(p["conv2_w"].shape[0], -1).astype(jnp.bfloat16),
        "conv2_b": p["conv2_b"].reshape(-1, 1).astype(jnp.float32),
        "fc1_w":   p["fc1_w"].T.astype(jnp.bfloat16),
        "fc1_b":   p["fc1_b"].reshape(1, -1).astype(jnp.float32),
        "fc2_w":   p["fc2_w"].T.astype(jnp.bfloat16),
        "fc2_b":   p["fc2_b"].reshape(1, -1).astype(jnp.float32),
    }


def reference_forward(x, p):
    """Pure-JAX f32 reference mirroring the PyTorch module."""
    dn = ("NCHW", "OIHW", "NCHW")
    y = jax.lax.conv_general_dilated(x, p["conv1_w"], (1, 1), ((1, 1), (1, 1)),
                                     dimension_numbers=dn)
    y = jax.nn.relu(y + p["conv1_b"][None, :, None, None])
    y = jax.lax.reduce_window(y, -jnp.inf, jax.lax.max,
                              (1, 1, 2, 2), (1, 1, 2, 2), "VALID")
    y = jax.lax.conv_general_dilated(y, p["conv2_w"], (1, 1), ((1, 1), (1, 1)),
                                     dimension_numbers=dn)
    y = jax.nn.relu(y + p["conv2_b"][None, :, None, None])
    y = jax.lax.reduce_window(y, -jnp.inf, jax.lax.max,
                              (1, 1, 2, 2), (1, 1, 2, 2), "VALID")
    f = y.reshape(x.shape[0], -1)
    h = jax.nn.relu(f @ p["fc1_w"].T + p["fc1_b"])
    return h @ p["fc2_w"].T + p["fc2_b"]


if __name__ == "__main__":
    key = jax.random.PRNGKey(0)
    kx, kp = jax.random.split(key)

    # batch=2; 3x32x32 input is implied by the module (64 * 8 * 8 after 2 pools)
    x = jax.random.normal(kx, (2, 3, 32, 32), jnp.float32)
    params = init_params(kp)
    kparams = prepare_params(params)   # one-time repack, outside the jitted forward

    fwd = jax.jit(simple_cnn_forward)
    out = fwd(x, kparams)
    jax.block_until_ready(out)
    assert out.shape == (2, 10) and out.dtype == jnp.float32

    ref = reference_forward(x, params)
    # All four matmuls run with bf16 operands (f32 accumulation), so compare
    # against the f32 reference with a scale-aware bf16-level tolerance.
    scale = float(jnp.max(jnp.abs(ref)))
    max_diff = float(jnp.max(jnp.abs(out - ref)))
    assert max_diff <= 0.03 * scale + 0.03, f"max abs diff {max_diff} (scale {scale})"

    print("KERNEL_OK")
</pallas_src>

<mosaic_0001>
module attributes {stable_mosaic.version = 11 : i64} {
  func.func @_conv_relu_pool_kernel(%arg0: i32, %arg1: memref<4x27x512xbf16, #tpu.memory_space<vmem>>, %arg2: memref<32x27xbf16, #tpu.memory_space<vmem>>, %arg3: memref<32x1xf32, #tpu.memory_space<vmem>>, %arg4: memref<32x512xf32, #tpu.memory_space<vmem>>) attributes {dimension_semantics = [#tpu.dimension_semantics<parallel>], iteration_bounds = array<i64: 1>, scalar_prefetch = 0 : i64, scratch_operands = 0 : i64, tpu.core_type = #tpu.core_type<tc>, window_params = [{transform_indices = @transform_0, window_bounds = array<i64: 4, 27, 512>}, {pipeline_mode = #tpu.pipeline_mode<synchronous>, transform_indices = @transform_1, window_bounds = array<i64: 32, 27>}, {pipeline_mode = #tpu.pipeline_mode<synchronous>, transform_indices = @transform_2, window_bounds = array<i64: 32, 1>}, {transform_indices = @transform_3, window_bounds = array<i64: 32, 512>}]} {
    %c0 = arith.constant 0 : index
    %c0_0 = arith.constant 0 : index
    %0 = vector.load %arg2[%c0, %c0_0] : memref<32x27xbf16, #tpu.memory_space<vmem>>, vector<32x27xbf16>
    %c0_1 = arith.constant 0 : index
    %c0_2 = arith.constant 0 : index
    %c0_3 = arith.constant 0 : index
    %1 = vector.load %arg1[%c0_1, %c0_2, %c0_3] : memref<4x27x512xbf16, #tpu.memory_space<vmem>>, vector<1x27x512xbf16>
    %2 = vector.shape_cast %1 : vector<1x27x512xbf16> to vector<27x512xbf16>
    %cst = arith.constant dense<0.000000e+00> : vector<32x512xf32>
    %3 = tpu.matmul %0, %2, %cst {dimension_numbers = #tpu.dot_dimension_numbers<[1], [0], [0], [1], [0, 0, 1, 1], [], []>} : vector<32x27xbf16>, vector<27x512xbf16>, vector<32x512xf32> -> vector<32x512xf32>
    %c1 = arith.constant 1 : index
    %c0_4 = arith.constant 0 : index
    %c0_5 = arith.constant 0 : index
    %4 = vector.load %arg1[%c1, %c0_4, %c0_5] : memref<4x27x512xbf16, #tpu.memory_space<vmem>>, vector<1x27x512xbf16>
    %5 = vector.shape_cast %4 : vector<1x27x512xbf16> to vector<27x512xbf16>
    %cst_6 = arith.constant dense<0.000000e+00> : vector<32x512xf32>
    %6 = tpu.matmul %0, %5, %cst_6 {dimension_numbers = #tpu.dot_dimension_numbers<[1], [0], [0], [1], [0, 0, 1, 1], [], []>} : vector<32x27xbf16>, vector<27x512xbf16>, vector<32x512xf32> -> vector<32x512xf32>
    %c2 = arith.constant 2 : index
    %c0_7 = arith.constant 0 : index
    %c0_8 = arith.constant 0 : index
    %7 = vector.load %arg1[%c2, %c0_7, %c0_8] : memref<4x27x512xbf16, #tpu.memory_space<vmem>>, vector<1x27x512xbf16>
    %8 = vector.shape_cast %7 : vector<1x27x512xbf16> to vector<27x512xbf16>
    %cst_9 = arith.constant dense<0.000000e+00> : vector<32x512xf32>
    %9 = tpu.matmul %0, %8, %cst_9 {dimension_numbers = #tpu.dot_dimension_numbers<[1], [0], [0], [1], [0, 0, 1, 1], [], []>} : vector<32x27xbf16>, vector<27x512xbf16>, vector<32x512xf32> -> vector<32x512xf32>
    %c3 = arith.constant 3 : index
    %c0_10 = arith.constant 0 : index
    %c0_11 = arith.constant 0 : index
    %10 = vector.load %arg1[%c3, %c0_10, %c0_11] : memref<4x27x512xbf16, #tpu.memory_space<vmem>>, vector<1x27x512xbf16>
    %11 = vector.shape_cast %10 : vector<1x27x512xbf16> to vector<27x512xbf16>
    %cst_12 = arith.constant dense<0.000000e+00> : vector<32x512xf32>
    %12 = tpu.matmul %0, %11, %cst_12 {dimension_numbers = #tpu.dot_dimension_numbers<[1], [0], [0], [1], [0, 0, 1, 1], [], []>} : vector<32x27xbf16>, vector<27x512xbf16>, vector<32x512xf32> -> vector<32x512xf32>
    %13 = arith.maximumf %3, %6 : vector<32x512xf32>
    %14 = arith.maximumf %9, %12 : vector<32x512xf32>
    %15 = arith.maximumf %13, %14 : vector<32x512xf32>
    %c0_13 = arith.constant 0 : index
    %c0_14 = arith.constant 0 : index
    %16 = vector.load %arg3[%c0_13, %c0_14] : memref<32x1xf32, #tpu.memory_space<vmem>>, vector<32x1xf32>
    %17 = vector.broadcast %16 : vector<32x1xf32> to vector<32x512xf32>
    %18 = arith.addf %15, %17 : vector<32x512xf32>
    %cst_15 = arith.constant 0.000000e+00 : f32
    %19 = vector.broadcast %cst_15 : f32 to vector<32x512xf32>
    %20 = arith.maximumf %18, %19 : vector<32x512xf32>
    %c0_16 = arith.constant 0 : index
    %c0_17 = arith.constant 0 : index
    %21 = vector.load %arg4[%c0_16, %c0_17] : memref<32x512xf32, #tpu.memory_space<vmem>>, vector<32x512xf32>
    tpu.vector_store %arg4[%c0_16, %c0_17], %20 {strides = array<i32>} : memref<32x512xf32, #tpu.memory_space<vmem>>, vector<32x512xf32>,
    return
  }
  func.func @transform_0(%arg0: i32) -> (i32, i32, i32) {
    %c0_i32 = arith.constant 0 : i32
    %c0_i32_0 = arith.constant 0 : i32
    %c0_i32_1 = arith.constant 0 : i32
    return %c0_i32, %c0_i32_0, %arg0 : i32, i32, i32
  }
  func.func @transform_1(%arg0: i32) -> (i32, i32) {
    %c0_i32 = arith.constant 0 : i32
    %c0_i32_0 = arith.constant 0 : i32
    %c0_i32_1 = arith.constant 0 : i32
    return %c0_i32, %c0_i32_0 : i32, i32
  }
  func.func @transform_2(%arg0: i32) -> (i32, i32) {
    %c0_i32 = arith.constant 0 : i32
    %c0_i32_0 = arith.constant 0 : i32
    %c0_i32_1 = arith.constant 0 : i32
    return %c0_i32, %c0_i32_0 : i32, i32
  }
  func.func @transform_3(%arg0: i32) -> (i32, i32) {
    %c0_i32 = arith.constant 0 : i32
    %c0_i32_0 = arith.constant 0 : i32
    return %c0_i32, %arg0 : i32, i32
  }
}

module attributes {stable_mosaic.version = 11 : i64} {
  func.func @_conv_relu_pool_kernel(%arg0: i32, %arg1: memref<4x288x128xbf16, #tpu.memory_space<vmem>>, %arg2: memref<64x288xbf16, #tpu.memory_space<vmem>>, %arg3: memref<64x1xf32, #tpu.memory_space<vmem>>, %arg4: memref<64x128xf32, #tpu.memory_space<vmem>>) attributes {dimension_semantics = [#tpu.dimension_semantics<parallel>], iteration_bounds = array<i64: 1>, scalar_prefetch = 0 : i64, scratch_operands = 0 : i64, tpu.core_type = #tpu.core_type<tc>, window_params = [{transform_indices = @transform_0, window_bounds = array<i64: 4, 288, 128>}, {pipeline_mode = #tpu.pipeline_mode<synchronous>, transform_indices = @transform_1, window_bounds = array<i64: 64, 288>}, {pipeline_mode = #tpu.pipeline_mode<synchronous>, transform_indices = @transform_2, window_bounds = array<i64: 64, 1>}, {transform_indices = @transform_3, window_bounds = array<i64: 64, 128>}]} {
    %c0 = arith.constant 0 : index
    %c0_0 = arith.constant 0 : index
    %0 = vector.load %arg2[%c0, %c0_0] : memref<64x288xbf16, #tpu.memory_space<vmem>>, vector<64x288xbf16>
    %c0_1 = arith.constant 0 : index
    %c0_2 = arith.constant 0 : index
    %c0_3 = arith.constant 0 : index
    %1 = vector.load %arg1[%c0_1, %c0_2, %c0_3] : memref<4x288x128xbf16, #tpu.memory_space<vmem>>, vector<1x288x128xbf16>
    %2 = vector.shape_cast %1 : vector<1x288x128xbf16> to vector<288x128xbf16>
    %cst = arith.constant dense<0.000000e+00> : vector<64x128xf32>
    %3 = tpu.matmul %0, %2, %cst {dimension_numbers = #tpu.dot_dimension_numbers<[1], [0], [0], [1], [0, 0, 1, 1], [], []>} : vector<64x288xbf16>, vector<288x128xbf16>, vector<64x128xf32> -> vector<64x128xf32>
    %c1 = arith.constant 1 : index
    %c0_4 = arith.constant 0 : index
    %c0_5 = arith.constant 0 : index
    %4 = vector.load %arg1[%c1, %c0_4, %c0_5] : memref<4x288x128xbf16, #tpu.memory_space<vmem>>, vector<1x288x128xbf16>
    %5 = vector.shape_cast %4 : vector<1x288x128xbf16> to vector<288x128xbf16>
    %cst_6 = arith.constant dense<0.000000e+00> : vector<64x128xf32>
    %6 = tpu.matmul %0, %5, %cst_6 {dimension_numbers = #tpu.dot_dimension_numbers<[1], [0], [0], [1], [0, 0, 1, 1], [], []>} : vector<64x288xbf16>, vector<288x128xbf16>, vector<64x128xf32> -> vector<64x128xf32>
    %c2 = arith.constant 2 : index
    %c0_7 = arith.constant 0 : index
    %c0_8 = arith.constant 0 : index
    %7 = vector.load %arg1[%c2, %c0_7, %c0_8] : memref<4x288x128xbf16, #tpu.memory_space<vmem>>, vector<1x288x128xbf16>
    %8 = vector.shape_cast %7 : vector<1x288x128xbf16> to vector<288x128xbf16>
    %cst_9 = arith.constant dense<0.000000e+00> : vector<64x128xf32>
    %9 = tpu.matmul %0, %8, %cst_9 {dimension_numbers = #tpu.dot_dimension_numbers<[1], [0], [0], [1], [0, 0, 1, 1], [], []>} : vector<64x288xbf16>, vector<288x128xbf16>, vector<64x128xf32> -> vector<64x128xf32>
    %c3 = arith.constant 3 : index
    %c0_10 = arith.constant 0 : index
    %c0_11 = arith.constant 0 : index
    %10 = vector.load %arg1[%c3, %c0_10, %c0_11] : memref<4x288x128xbf16, #tpu.memory_space<vmem>>, vector<1x288x128xbf16>
    %11 = vector.shape_cast %10 : vector<1x288x128xbf16> to vector<288x128xbf16>
    %cst_12 = arith.constant dense<0.000000e+00> : vector<64x128xf32>
    %12 = tpu.matmul %0, %11, %cst_12 {dimension_numbers = #tpu.dot_dimension_numbers<[1], [0], [0], [1], [0, 0, 1, 1], [], []>} : vector<64x288xbf16>, vector<288x128xbf16>, vector<64x128xf32> -> vector<64x128xf32>
    %13 = arith.maximumf %3, %6 : vector<64x128xf32>
    %14 = arith.maximumf %9, %12 : vector<64x128xf32>
    %15 = arith.maximumf %13, %14 : vector<64x128xf32>
    %c0_13 = arith.constant 0 : index
    %c0_14 = arith.constant 0 : index
    %16 = vector.load %arg3[%c0_13, %c0_14] : memref<64x1xf32, #tpu.memory_space<vmem>>, vector<64x1xf32>
    %17 = vector.broadcast %16 : vector<64x1xf32> to vector<64x128xf32>
    %18 = arith.addf %15, %17 : vector<64x128xf32>
    %cst_15 = arith.constant 0.000000e+00 : f32
    %19 = vector.broadcast %cst_15 : f32 to vector<64x128xf32>
    %20 = arith.maximumf %18, %19 : vector<64x128xf32>
    %c0_16 = arith.constant 0 : index
    %c0_17 = arith.constant 0 : index
    %21 = vector.load %arg4[%c0_16, %c0_17] : memref<64x128xf32, #tpu.memory_space<vmem>>, vector<64x128xf32>
    tpu.vector_store %arg4[%c0_16, %c0_17], %20 {strides = array<i32>} : memref<64x128xf32, #tpu.memory_space<vmem>>, vector<64x128xf32>,
    return
  }
  func.func @transform_0(%arg0: i32) -> (i32, i32, i32) {
    %c0_i32 = arith.constant 0 : i32
    %c0_i32_0 = arith.constant 0 : i32
    %c0_i32_1 = arith.constant 0 : i32
    return %c0_i32, %c0_i32_0, %arg0 : i32, i32, i32
  }
  func.func @transform_1(%arg0: i32) -> (i32, i32) {
    %c0_i32 = arith.constant 0 : i32
    %c0_i32_0 = arith.constant 0 : i32
    %c0_i32_1 = arith.constant 0 : i32
    return %c0_i32, %c0_i32_0 : i32, i32
  }
  func.func @transform_2(%arg0: i32) -> (i32, i32) {
    %c0_i32 = arith.constant 0 : i32
    %c0_i32_0 = arith.constant 0 : i32
    %c0_i32_1 = arith.constant 0 : i32
    return %c0_i32, %c0_i32_0 : i32, i32
  }
  func.func @transform_3(%arg0: i32) -> (i32, i32) {
    %c0_i32 = arith.constant 0 : i32
    %c0_i32_0 = arith.constant 0 : i32
    return %c0_i32, %arg0 : i32, i32
  }
}

module attributes {stable_mosaic.version = 11 : i64} {
  func.func @_mlp_kernel(%arg0: i32, %arg1: memref<2x512xf32, #tpu.memory_space<vmem>>, %arg2: memref<512x256xbf16, #tpu.memory_space<vmem>>, %arg3: memref<1x256xf32, #tpu.memory_space<vmem>>, %arg4: memref<256x10xbf16, #tpu.memory_space<vmem>>, %arg5: memref<1x10xf32, #tpu.memory_space<vmem>>, %arg6: memref<2x10xf32, #tpu.memory_space<vmem>>, %arg7: memref<2x256xf32, #tpu.memory_space<vmem>>) attributes {dimension_semantics = [#tpu.dimension_semantics<arbitrary>], iteration_bounds = array<i64: 8>, scalar_prefetch = 0 : i64, scratch_operands = 1 : i64, tpu.core_type = #tpu.core_type<tc>, window_params = [{transform_indices = @transform_0, window_bounds = array<i64: 2, 512>}, {transform_indices = @transform_1, window_bounds = array<i64: 512, 256>}, {pipeline_mode = #tpu.pipeline_mode<synchronous>, transform_indices = @transform_2, window_bounds = array<i64: 1, 256>}, {pipeline_mode = #tpu.pipeline_mode<synchronous>, transform_indices = @transform_3, window_bounds = array<i64: 256, 10>}, {pipeline_mode = #tpu.pipeline_mode<synchronous>, transform_indices = @transform_4, window_bounds = array<i64: 1, 10>}, {pipeline_mode = #tpu.pipeline_mode<synchronous>, transform_indices = @transform_5, window_bounds = array<i64: 2, 10>}]} {
    %c0_i32 = arith.constant 0 : i32
    %0 = arith.cmpi eq, %arg0, %c0_i32 : i32
    %1 = arith.extui %0 : i1 to i32
    %c0_i32_0 = arith.constant 0 : i32
    %2 = arith.cmpi ne, %1, %c0_i32_0 : i32
    scf.if %2 {
      %cst_9 = arith.constant 0.000000e+00 : f32
      %13 = vector.broadcast %cst_9 : f32 to vector<2x256xf32>
      %c0_10 = arith.constant 0 : index
      %c0_11 = arith.constant 0 : index
      %14 = vector.load %arg7[%c0_10, %c0_11] : memref<2x256xf32, #tpu.memory_space<vmem>>, vector<2x256xf32>
      tpu.vector_store %arg7[%c0_10, %c0_11], %13 {strides = array<i32>} : memref<2x256xf32, #tpu.memory_space<vmem>>, vector<2x256xf32>,
    } else {
    }
    %c0 = arith.constant 0 : index
    %c0_1 = arith.constant 0 : index
    %3 = vector.load %arg7[%c0, %c0_1] : memref<2x256xf32, #tpu.memory_space<vmem>>, vector<2x256xf32>
    %c0_2 = arith.constant 0 : index
    %c0_3 = arith.constant 0 : index
    %4 = vector.load %arg1[%c0_2, %c0_3] : memref<2x512xf32, #tpu.memory_space<vmem>>, vector<2x512xf32>
    %5 = arith.truncf %4 : vector<2x512xf32> to vector<2x512xbf16>
    %c0_4 = arith.constant 0 : index
    %c0_5 = arith.constant 0 : index
    %6 = vector.load %arg2[%c0_4, %c0_5] : memref<512x256xbf16, #tpu.memory_space<vmem>>, vector<512x256xbf16>
    %cst = arith.constant dense<0.000000e+00> : vector<2x256xf32>
    %7 = tpu.matmul %5, %6, %cst {dimension_numbers = #tpu.dot_dimension_numbers<[1], [0], [0], [1], [0, 0, 1, 1], [], []>} : vector<2x512xbf16>, vector<512x256xbf16>, vector<2x256xf32> -> vector<2x256xf32>
    %8 = arith.addf %3, %7 : vector<2x256xf32>
    %c0_6 = arith.constant 0 : index
    %c0_7 = arith.constant 0 : index
    %9 = vector.load %arg7[%c0_6, %c0_7] : memref<2x256xf32, #tpu.memory_space<vmem>>, vector<2x256xf32>
    tpu.vector_store %arg7[%c0_6, %c0_7], %8 {strides = array<i32>} : memref<2x256xf32, #tpu.memory_space<vmem>>, vector<2x256xf32>,
    %c7_i32 = arith.constant 7 : i32
    %10 = arith.cmpi eq, %arg0, %c7_i32 : i32
    %11 = arith.extui %10 : i1 to i32
    %c0_i32_8 = arith.constant 0 : i32
    %12 = arith.cmpi ne, %11, %c0_i32_8 : i32
    scf.if %12 {
      %c0_9 = arith.constant 0 : index
      %c0_10 = arith.constant 0 : index
      %13 = vector.load %arg7[%c0_9, %c0_10] : memref<2x256xf32, #tpu.memory_space<vmem>>, vector<2x256xf32>
      %c0_11 = arith.constant 0 : index
      %c0_12 = arith.constant 0 : index
      %14 = vector.load %arg3[%c0_11, %c0_12] : memref<1x256xf32, #tpu.memory_space<vmem>>, vector<1x256xf32>
      %15 = vector.broadcast %14 : vector<1x256xf32> to vector<2x256xf32>
      %16 = arith.addf %13, %15 : vector<2x256xf32>
      %cst_13 = arith.constant 0.000000e+00 : f32
      %17 = vector.broadcast %cst_13 : f32 to vector<2x256xf32>
      %18 = arith.maximumf %16, %17 : vector<2x256xf32>
      %19 = arith.truncf %18 : vector<2x256xf32> to vector<2x256xbf16>
      %c0_14 = arith.constant 0 : index
      %c0_15 = arith.constant 0 : index
      %20 = vector.load %arg4[%c0_14, %c0_15] : memref<256x10xbf16, #tpu.memory_space<vmem>>, vector<256x10xbf16>
      %cst_16 = arith.constant dense<0.000000e+00> : vector<2x10xf32>
      %21 = tpu.matmul %19, %20, %cst_16 {dimension_numbers = #tpu.dot_dimension_numbers<[1], [0], [0], [1], [0, 0, 1, 1], [], []>} : vector<2x256xbf16>, vector<256x10xbf16>, vector<2x10xf32> -> vector<2x10xf32>
      %c0_17 = arith.constant 0 : index
      %c0_18 = arith.constant 0 : index
      %22 = vector.load %arg5[%c0_17, %c0_18] : memref<1x10xf32, #tpu.memory_space<vmem>>, vector<1x10xf32>
      %23 = vector.broadcast %22 : vector<1x10xf32> to vector<2x10xf32>
      %24 = arith.addf %21, %23 : vector<2x10xf32>
      %c0_19 = arith.constant 0 : index
      %c0_20 = arith.constant 0 : index
      %25 = vector.load %arg6[%c0_19, %c0_20] : memref<2x10xf32, #tpu.memory_space<vmem>>, vector<2x10xf32>
      tpu.vector_store %arg6[%c0_19, %c0_20], %24 {strides = array<i32>} : memref<2x10xf32, #tpu.memory_space<vmem>>, vector<2x10xf32>,
    } else {
    }
    return
  }
  func.func @transform_0(%arg0: i32) -> (i32, i32) {
    %c0_i32 = arith.constant 0 : i32
    %c0_i32_0 = arith.constant 0 : i32
    return %c0_i32, %arg0 : i32, i32
  }
  func.func @transform_1(%arg0: i32) -> (i32, i32) {
    %c0_i32 = arith.constant 0 : i32
    %c0_i32_0 = arith.constant 0 : i32
    return %arg0, %c0_i32 : i32, i32
  }
  func.func @transform_2(%arg0: i32) -> (i32, i32) {
    %c0_i32 = arith.constant 0 : i32
    %c0_i32_0 = arith.constant 0 : i32
    %c0_i32_1 = arith.constant 0 : i32
    return %c0_i32, %c0_i32_0 : i32, i32
  }
  func.func @transform_3(%arg0: i32) -> (i32, i32) {
    %c0_i32 = arith.constant 0 : i32
    %c0_i32_0 = arith.constant 0 : i32
    %c0_i32_1 = arith.constant 0 : i32
    return %c0_i32, %c0_i32_0 : i32, i32
  }
  func.func @transform_4(%arg0: i32) -> (i32, i32) {
    %c0_i32 = arith.constant 0 : i32
    %c0_i32_0 = arith.constant 0 : i32
    %c0_i32_1 = arith.constant 0 : i32
    return %c0_i32, %c0_i32_0 : i32, i32
  }
  func.func @transform_5(%arg0: i32) -> (i32, i32) {
    %c0_i32 = arith.constant 0 : i32
    %c0_i32_0 = arith.constant 0 : i32
    %c0_i32_1 = arith.constant 0 : i32
    return %c0_i32, %c0_i32_0 : i32, i32
  }
}

</mosaic_0001>

<bundles_post_ra>
// kernel: simple_cnn_forward.3
= control target key start
LH: loop header
LB: loop body
LE: loop exit
PB: predicated region body
PF: predicated region fallthrough
CT: control target
= control target key end

     0   :  { %vm80_vm0 = vcmask 1044480   ;;  %vm81_vm1 = vcmask 1045504   ;;  %v943_v1 = vmov 65535   ;;  %v944_v3 = vmov 0   ;;  %s1337_s0 = inlined_call_operand.vmem [shape: bf16[4,27,512], index: 0, kind: input, shape index: {}]   ;;  %s1338_s1 = inlined_call_operand.vmem [shape: bf16[32,27], index: 1, kind: input, shape index: {}]   ;;  %s1339_s2 = inlined_call_operand.vmem [shape: f32[32,1], index: 2, kind: input, shape index: {}]   ;;  %s1340_s3 = inlined_call_operand.vmem [shape: f32[32,512], index: 3, kind: output, shape index: {}]  }
   0x1   :  { %v893_v0 = vld [vmem:[%s1337_s0 + $0x4] ss:$16 sps:$4 sm:$0xff]   ;;  %v82_v2 = vsel %vm80_vm0, 4294967295, %v943_v1  ;;  %128 = vmatprep.mubr.bf16.mxu0 %v944_v3  ;;  %181 = vmatprep.mubr.bf16.mxu1 %v944_v3  ;;  %v895_v4 = vld [vmem:[%s1337_s0 + $0xc] ss:$16 sps:$4 sm:$0xff]   ;;  %vm73_vm2 = vcmask 220160  }
   0x2   :  { %891 = vset.pattern.permute.xlu0 %v944_v3  ;;  %892 = vset.pattern.permute.xlu1 %v944_v3  ;;  %v897_v5 = vld [vmem:[%s1337_s0] ss:$16 sps:$4 sm:$0xff]   ;;  %v898_v6 = vld [vmem:[%s1337_s0 + $0x8] ss:$16 sps:$4 sm:$0xff]   ;;  %v981_v7 = vsel %vm81_vm1, %v82_v2, 0 }
   0x3   :  { %96 = vmatprep.subr.bf16.mxu0 %v893_v0  ;;  %149 = vmatprep.subr.bf16.mxu1 %v895_v4  ;;  %v899_v8 = vld [vmem:[%s1337_s0 + $0x24] ss:$16 sps:$4 sm:$0x3f]   ;;  %v901_v9 = vld [vmem:[%s1337_s0 + $0x2c] ss:$16 sps:$4 sm:$0x3f]  }
   0x4   :  { %97 = vmatpush1.bf16.msra.mxu0 %v897_v5  ;;  %150 = vmatpush1.bf16.msra.mxu1 %v898_v6  ;;  %v88_v10 = vand.u32 %v899_v8, %v981_v7  ;;  %v903_v11 = vld [vmem:[%s1337_s0 + $0x20] ss:$16 sps:$4 sm:$0x3f]   ;;  %v904_v12 = vld [vmem:[%s1337_s0 + $0x28] ss:$16 sps:$4 sm:$0x3f]   ;;  %v94_v13 = vand.u32 %v901_v9, %v981_v7 }
   0x5   :  { %v1000_v14 = vld [vmem:[%s1338_s1] sm:$0xff]   ;;  %v85_v15 = vand.u32 %v903_v11, %v981_v7  ;;  %v91_v16 = vand.u32 %v904_v12, %v981_v7  ;;  %v909_v19 = vld [vmem:[%s1337_s0 + $0x48] ss:$16 sps:$4 sm:$0xff]   ;;  %v911_v20 = vld [vmem:[%s1337_s0 + $0x4c] ss:$16 sps:$4 sm:$0xff]  }
   0x6   :  { %98 = vmatprep.subr.bf16.mxu0 %v88_v10  ;;  %v906_v17 = vld [vmem:[%s1337_s0 + $0x40] ss:$16 sps:$4 sm:$0xff]   ;;  %v908_v18 = vld [vmem:[%s1337_s0 + $0x44] ss:$16 sps:$4 sm:$0xff]   ;;  %151 = vmatprep.subr.bf16.mxu1 %v94_v13  ;;  %v924_v30 = vld [vmem:[%s1337_s0 + $0x8c] ss:$16 sps:$4 sm:$0xff]  }
   0x7   :  { %v913_v21 = vld [vmem:[%s1337_s0 + $0x60] ss:$16 sps:$4 sm:$0x3f]   ;;  %v915_v22 = vld [vmem:[%s1337_s0 + $0x64] ss:$16 sps:$4 sm:$0x3f]  }
   0x8   :  { %99 = vmatpush1.bf16.msra.mxu0 %v85_v15  ;;  %152 = vmatpush1.bf16.msra.mxu1 %v91_v16  ;;  %v916_v23 = vld [vmem:[%s1337_s0 + $0x68] ss:$16 sps:$4 sm:$0x3f]   ;;  %v251_v24 = vand.u32 %v915_v22, %v981_v7  ;;  %v918_v25 = vld [vmem:[%s1337_s0 + $0x6c] ss:$16 sps:$4 sm:$0x3f]   ;;  %v248_v26 = vand.u32 %v913_v21, %v981_v7 }
   0x9   :  { %259 = vmatprep.subr.bf16.mxu0 %v908_v18  ;;  %312 = vmatprep.subr.bf16.mxu1 %v911_v20  ;;  %v254_v27 = vand.u32 %v916_v23, %v981_v7  ;;  %v921_v28 = vld [vmem:[%s1337_s0 + $0x84] ss:$16 sps:$4 sm:$0xff]   ;;  %v257_v29 = vand.u32 %v918_v25, %v981_v7  ;;  %v1047_v31 = vld [vmem:[%s1338_s1 + $0x8] sm:$0xff]   ;;  %v919_v35 = vld [vmem:[%s1337_s0 + $0x80] ss:$16 sps:$4 sm:$0xff]  }
   0xa   :  { %v927_v32 = vld [vmem:[%s1337_s0 + $0xa4] ss:$16 sps:$4 sm:$0x3f]   ;;  %v930_v33 = vld [vmem:[%s1337_s0 + $0xac] ss:$16 sps:$4 sm:$0x3f]  }
   0xb   :  { %825 = vmatmul.mubr.msk.bf16.vlgmr.msra.gmra.mrb[0].mxu0 %vm73_vm2, %v1000_v14  ;;  %827 = vmatmul.mubr.msk.bf16.vlgmr.msra.gmra.mrb[0].mxu1 %vm73_vm2, %v1000_v14  ;;  %v739_v34 = vld [vmem:[%s1339_s2] sm:$0xff]  ;;  %v922_v37 = vld [vmem:[%s1337_s0 + $0x88] ss:$16 sps:$4 sm:$0xff]   ;;  %v741_v39 = vld [vmem:[%s1339_s2 + $0x10] sm:$0xff]  ;;  %v414_v40 = vand.u32 %v927_v32, %v981_v7  ;;  %v420_v41 = vand.u32 %v930_v33, %v981_v7 }
   0xc   :  { %260 = vmatpush1.bf16.msra.mxu0 %v906_v17  ;;  %313 = vmatpush1.bf16.msra.mxu1 %v909_v19  ;;  %v925_v36 = vld [vmem:[%s1337_s0 + $0xa0] ss:$16 sps:$4 sm:$0x3f]   ;;  %v928_v38 = vld [vmem:[%s1337_s0 + $0xa8] ss:$16 sps:$4 sm:$0x3f]  }
   0xd   :  { %138 = vmatprep.mubr.bf16.mxu0 %v944_v3  ;;  %191 = vmatprep.mubr.bf16.mxu1 %v944_v3  ;;  %v411_v42 = vand.u32 %v925_v36, %v981_v7  ;;  %v417_v43 = vand.u32 %v928_v38, %v981_v7  ;;  %v740_v44 = vld [vmem:[%s1339_s2 + $0x8] sm:$0xff]  ;;  %v742_v45 = vld [vmem:[%s1339_s2 + $0x18] sm:$0xff]  ;;  %v933_v46 = vld [vmem:[%s1337_s0 + $0xc4] ss:$16 sps:$4 sm:$0xff]  }
   0xe   :  { %261 = vmatprep.subr.bf16.mxu0 %v251_v24  ;;  %314 = vmatprep.subr.bf16.mxu1 %v257_v29  ;;  %v936_v47 = vld [vmem:[%s1337_s0 + $0xcc] ss:$16 sps:$4 sm:$0xff]   ;;  %v939_v48 = vld [vmem:[%s1337_s0 + $0xe4] ss:$16 sps:$4 sm:$0x3f]  }
   0xf   :  { %745 = vperm.xlu0 %891, %v739_v34   ;;  %755 = vperm.xlu1 %892, %v741_v39   ;;  %v942_v49 = vld [vmem:[%s1337_s0 + $0xec] ss:$16 sps:$4 sm:$0x3f]   ;;  %v931_v50 = vld [vmem:[%s1337_s0 + $0xc0] ss:$16 sps:$4 sm:$0xff]   ;;  %v577_v54 = vand.u32 %v939_v48, %v981_v7 }
  0x10   :  { %262 = vmatpush1.bf16.msra.mxu0 %v248_v26  ;;  %315 = vmatpush1.bf16.msra.mxu1 %v254_v27  ;;  %v934_v51 = vld [vmem:[%s1337_s0 + $0xc8] ss:$16 sps:$4 sm:$0xff]   ;;  %v937_v52 = vld [vmem:[%s1337_s0 + $0xe0] ss:$16 sps:$4 sm:$0x3f]   ;;  %v583_v55 = vand.u32 %v942_v49, %v981_v7 }
  0x11   :  { %422 = vmatprep.subr.bf16.mxu0 %v921_v28  ;;  %475 = vmatprep.subr.bf16.mxu1 %v924_v30  ;;  %v940_v53 = vld [vmem:[%s1337_s0 + $0xe8] ss:$16 sps:$4 sm:$0x3f]   ;;  %v574_v56 = vand.u32 %v937_v52, %v981_v7 }
  0x12   :  { %v580_v57 = vand.u32 %v940_v53, %v981_v7 }
  0x13   :  { %826 = vmatmul.mubr.msk.bf16.gmra.mrb[4].mxu0 %vm73_vm2, %v1047_v31  ;;  %828 = vmatmul.mubr.msk.bf16.gmra.mrb[4].mxu1 %vm73_vm2, %v1047_v31 }
  0x14   :  { %291 = vmatprep.mubr.bf16.mxu0 %v944_v3  ;;  %344 = vmatprep.mubr.bf16.mxu1 %v944_v3 }
  0x15   :  { %750 = vperm.xlu0 %891, %v740_v44   ;;  %760 = vperm.xlu1 %892, %v742_v45  }
  0x1b   :  { %845 = vmatmul.mubr.msk.bf16.vlgmr.msra.gmra.mrb[8].mxu0 %vm73_vm2, %v1000_v14  ;;  %847 = vmatmul.mubr.msk.bf16.vlgmr.msra.gmra.mrb[8].mxu1 %vm73_vm2, %v1000_v14 }
  0x1c   :  { %423 = vmatpush1.bf16.msra.mxu0 %v919_v35  ;;  %476 = vmatpush1.bf16.msra.mxu1 %v922_v37 }
  0x1d   :  { %301 = vmatprep.mubr.bf16.mxu0 %v944_v3  ;;  %354 = vmatprep.mubr.bf16.mxu1 %v944_v3 }
  0x1e   :  { %424 = vmatprep.subr.bf16.mxu0 %v414_v40  ;;  %477 = vmatprep.subr.bf16.mxu1 %v420_v41 }
  0x20   :  { %425 = vmatpush1.bf16.msra.mxu0 %v411_v42  ;;  %478 = vmatpush1.bf16.msra.mxu1 %v417_v43 }
  0x21   :  { %585 = vmatprep.subr.bf16.mxu0 %v933_v46  ;;  %638 = vmatprep.subr.bf16.mxu1 %v936_v47 }
  0x23   :  { %846 = vmatmul.mubr.msk.bf16.gmra.mrb[12].mxu0 %vm73_vm2, %v1047_v31  ;;  %848 = vmatmul.mubr.msk.bf16.gmra.mrb[12].mxu1 %vm73_vm2, %v1047_v31 }
  0x24   :  { %454 = vmatprep.mubr.bf16.mxu0 %v944_v3  ;;  %507 = vmatprep.mubr.bf16.mxu1 %v944_v3 }
  0x2b   :  { %865 = vmatmul.mubr.msk.bf16.vlgmr.msra.gmra.mrb[16].mxu0 %vm73_vm2, %v1000_v14  ;;  %867 = vmatmul.mubr.msk.bf16.vlgmr.msra.gmra.mrb[16].mxu1 %vm73_vm2, %v1000_v14 }
  0x2c   :  { %586 = vmatpush1.bf16.msra.mxu0 %v931_v50  ;;  %639 = vmatpush1.bf16.msra.mxu1 %v934_v51 }
  0x2d   :  { %464 = vmatprep.mubr.bf16.mxu0 %v944_v3  ;;  %517 = vmatprep.mubr.bf16.mxu1 %v944_v3 }
  0x2e   :  { %587 = vmatprep.subr.bf16.mxu0 %v577_v54  ;;  %640 = vmatprep.subr.bf16.mxu1 %v583_v55 }
  0x30   :  { %588 = vmatpush1.bf16.msra.mxu0 %v574_v56  ;;  %641 = vmatpush1.bf16.msra.mxu1 %v580_v57 }
  0x33   :  { %866 = vmatmul.mubr.msk.bf16.gmra.mrb[20].mxu0 %vm73_vm2, %v1047_v31  ;;  %868 = vmatmul.mubr.msk.bf16.gmra.mrb[20].mxu1 %vm73_vm2, %v1047_v31 }
  0x34   :  { %617 = vmatprep.mubr.bf16.mxu0 %v944_v3  ;;  %670 = vmatprep.mubr.bf16.mxu1 %v944_v3 }
  0x3b   :  { %885 = vmatmul.mubr.msk.bf16.vlgmr.msra.gmra.mrb[24].mxu0 %vm73_vm2, %v1000_v14  ;;  %887 = vmatmul.mubr.msk.bf16.vlgmr.msra.gmra.mrb[24].mxu1 %vm73_vm2, %v1000_v14 }
  0x3c   :  { %627 = vmatprep.mubr.bf16.mxu0 %v944_v3  ;;  %680 = vmatprep.mubr.bf16.mxu1 %v944_v3 }
  0x43   :  { %886 = vmatmul.mubr.msk.bf16.gmra.mrb[28].mxu0 %vm73_vm2, %v1047_v31  ;;  %888 = vmatmul.mubr.msk.bf16.gmra.mrb[28].mxu1 %vm73_vm2, %v1047_v31 }
  0xde   :  { %v1151_v58 = vpop.f32.mrb[0].mxu0  ;;  %v1153_v59 = vpop.f32.mrb[0].mxu1 }
  0xdf   :  { %v1155_v60 = vpop.f32.mrb[1].mxu0  ;;  %v1157_v61 = vpop.f32.mrb[1].mxu1 }
  0xe0   :  { %v1159_v62 = vpop.f32.mrb[2].mxu0  ;;  %v1161_v63 = vpop.f32.mrb[2].mxu1 }
  0xe1   :  { %v1163_v0 = vpop.f32.mrb[3].mxu0  ;;  %v1165_v1 = vpop.f32.mrb[3].mxu1 }
  0xe6   :  { %v1167_v2 = vpop.f32.mrb[4].mxu0  ;;  %v1169_v3 = vpop.f32.mrb[4].mxu1 }
  0xe7   :  { %v1171_v4 = vpop.f32.mrb[5].mxu0  ;;  %v1173_v5 = vpop.f32.mrb[5].mxu1 }
  0xe8   :  { %v1175_v6 = vpop.f32.mrb[6].mxu0  ;;  %v1177_v7 = vpop.f32.mrb[6].mxu1 }
  0xe9   :  { %v1179_v8 = vpop.f32.mrb[7].mxu0  ;;  %v1181_v9 = vpop.f32.mrb[7].mxu1 }
  0xee   :  { %v293_v10 = vpop.f32.mrb[8].mxu0  ;;  %v346_v11 = vpop.f32.mrb[8].mxu1 }
  0xef   :  { %v691_v12 = vmax.f32 %v1151_v58, %v293_v10  ;;  %v693_v13 = vmax.f32 %v1153_v59, %v346_v11  ;;  %v295_v14 = vpop.f32.mrb[9].mxu0  ;;  %v348_v15 = vpop.f32.mrb[9].mxu1 }
  0xf0   :  { %v692_v16 = vmax.f32 %v1155_v60, %v295_v14  ;;  %v694_v17 = vmax.f32 %v1157_v61, %v348_v15  ;;  %v1187_v18 = vpop.f32.mrb[10].mxu0  ;;  %v1189_v19 = vpop.f32.mrb[10].mxu1 }
  0xf1   :  { %v695_v20 = vmax.f32 %v1159_v62, %v1187_v18  ;;  %v697_v21 = vmax.f32 %v1161_v63, %v1189_v19  ;;  %v1195_v22 = vpop.f32.mrb[11].mxu0  ;;  %v1197_v23 = vpop.f32.mrb[11].mxu1 }
  0xf2   :  { %v746_v58 = vpop.permute.xlu0 %745 }
  0xf6   :  { %v1203_v26 = vpop.f32.mrb[12].mxu0  ;;  %v1205_v27 = vpop.f32.mrb[12].mxu1 }
  0xf7   :  { %v1211_v30 = vpop.f32.mrb[13].mxu0  ;;  %v1213_v31 = vpop.f32.mrb[13].mxu1 }
  0xf8   :  { %v1219_v34 = vpop.f32.mrb[14].mxu0  ;;  %v1221_v35 = vpop.f32.mrb[14].mxu1 }
  0xf9   :  { %v1227_v38 = vpop.f32.mrb[15].mxu0  ;;  %v1229_v39 = vpop.f32.mrb[15].mxu1 }
  0xfa   :  { %1342 = vst [vmem:[#allocation2_spill] sm:$0xff] %v1229_v39  ;;  %v751_v24 = vpop.permute.xlu0 %750 }
  0xfe   :  { %v456_v42 = vpop.f32.mrb[16].mxu0  ;;  %v509_v43 = vpop.f32.mrb[16].mxu1 }
  0xff   :  { %v458_v44 = vpop.f32.mrb[17].mxu0  ;;  %v511_v45 = vpop.f32.mrb[17].mxu1 }
 0x100   :  { %v460_v46 = vpop.f32.mrb[18].mxu0  ;;  %v513_v47 = vpop.f32.mrb[18].mxu1 }
 0x101   :  { %v462_v48 = vpop.f32.mrb[19].mxu0  ;;  %v515_v49 = vpop.f32.mrb[19].mxu1 }
 0x106   :  { %v1235_v50 = vpop.f32.mrb[20].mxu0  ;;  %v1237_v51 = vpop.f32.mrb[20].mxu1 }
 0x107   :  { %v1239_v52 = vpop.f32.mrb[21].mxu0  ;;  %v1241_v53 = vpop.f32.mrb[21].mxu1 }
 0x108   :  { %v1243_v54 = vpop.f32.mrb[22].mxu0  ;;  %v1245_v55 = vpop.f32.mrb[22].mxu1 }
 0x109   :  { %v1247_v56 = vpop.f32.mrb[23].mxu0  ;;  %v1249_v57 = vpop.f32.mrb[23].mxu1 }
 0x10e   :  { %v619_v59 = vpop.f32.mrb[24].mxu0  ;;  %v672_v60 = vpop.f32.mrb[24].mxu1 }
 0x10f   :  { %v707_v61 = vmax.f32 %v456_v42, %v619_v59  ;;  %v709_v62 = vmax.f32 %v509_v43, %v672_v60  ;;  %v621_v63 = vpop.f32.mrb[25].mxu0  ;;  %v674_v10 = vpop.f32.mrb[25].mxu1 }
 0x110   :  { %v708_v11 = vmax.f32 %v458_v44, %v621_v63  ;;  %v710_v14 = vmax.f32 %v511_v45, %v674_v10  ;;  %v623_v15 = vpop.f32.mrb[26].mxu0  ;;  %v676_v18 = vpop.f32.mrb[26].mxu1  ;;  %v1343_v45 = vmax.f32 %v1163_v0, %v1195_v22 }
 0x111   :  { %v723_v19 = vmax.f32 %v691_v12, %v707_v61  ;;  %v725_v41 = vmax.f32 %v693_v13, %v709_v62  ;;  %v711_v40 = vmax.f32 %v460_v46, %v623_v15  ;;  %v713_v37 = vmax.f32 %v513_v47, %v676_v18  ;;  %v625_v36 = vpop.f32.mrb[27].mxu0  ;;  %v678_v33 = vpop.f32.mrb[27].mxu1 }
 0x112   :  { %v724_v32 = vmax.f32 %v692_v16, %v708_v11  ;;  %v726_v29 = vmax.f32 %v694_v17, %v710_v14  ;;  %v712_v28 = vmax.f32 %v462_v48, %v625_v36  ;;  %v714_v25 = vmax.f32 %v515_v49, %v678_v33  ;;  %v756_v33 = vpop.permute.xlu1 %755 }
 0x113   :  { %v763_v39 = vadd.f32 %v746_v58, %v723_v19  ;;  %v765_v42 = vadd.f32 %v746_v58, %v725_v41  ;;  %v727_v43 = vmax.f32 %v695_v20, %v711_v40  ;;  %v729_v59 = vmax.f32 %v697_v21, %v713_v37 }
 0x114   :  { %v764_v60 = vadd.f32 %v746_v58, %v724_v32  ;;  %v766_v44 = vadd.f32 %v746_v58, %v726_v29  ;;  %v728_v12 = vmax.f32 %v1343_v45, %v712_v28  ;;  %v1344_v13 = vmax.f32 %v1165_v1, %v1197_v23 }
 0x115   :  { %v779_v47 = vmax.f32 %v763_v39, 0.0  ;;  %v781_v16 = vmax.f32 %v765_v42, 0.0  ;;  %v767_v17 = vadd.f32 %v751_v24, %v727_v43  ;;  %v769_v36 = vadd.f32 %v751_v24, %v729_v59 }
 0x116   :  { %v730_v46 = vmax.f32 %v1344_v13, %v714_v25  ;;  %v780_v48 = vmax.f32 %v764_v60, 0.0  ;;  %v782_v49 = vmax.f32 %v766_v44, 0.0  ;;  %v768_v41 = vadd.f32 %v751_v24, %v728_v12  ;;  %v629_v21 = vpop.f32.mrb[28].mxu0  ;;  %v682_v32 = vpop.f32.mrb[28].mxu1 }
 0x117   :  { %795 = vst [vmem:[%s1340_s3] sm:$0xff] %v779_v47  ;;  %797 = vst [vmem:[%s1340_s3 + $0x10] sm:$0xff] %v781_v16  ;;  %v783_v0 = vmax.f32 %v767_v17, 0.0  ;;  %v785_v1 = vmax.f32 %v769_v36, 0.0  ;;  %v715_v22 = vmax.f32 %v1235_v50, %v629_v21  ;;  %v717_v23 = vmax.f32 %v1237_v51, %v682_v32  ;;  %v631_v25 = vpop.f32.mrb[29].mxu0  ;;  %v684_v28 = vpop.f32.mrb[29].mxu1 }
 0x118   :  { %v770_v20 = vadd.f32 %v751_v24, %v730_v46  ;;  %796 = vst [vmem:[%s1340_s3 + $0x8] sm:$0xff] %v780_v48  ;;  %798 = vst [vmem:[%s1340_s3 + $0x18] sm:$0xff] %v782_v49  ;;  %v784_v24 = vmax.f32 %v768_v41, 0.0  ;;  %v716_v37 = vmax.f32 %v1239_v52, %v631_v25  ;;  %v718_v39 = vmax.f32 %v1241_v53, %v684_v28  ;;  %v633_v40 = vpop.f32.mrb[30].mxu0  ;;  %v686_v50 = vpop.f32.mrb[30].mxu1 }
 0x119   :  { %799 = vst [vmem:[%s1340_s3 + $0x20] sm:$0xff] %v783_v0  ;;  %801 = vst [vmem:[%s1340_s3 + $0x30] sm:$0xff] %v785_v1  ;;  %v1345_v51 = vmax.f32 %v1167_v2, %v1203_v26  ;;  %v1346_v61 = vmax.f32 %v1169_v3, %v1205_v27  ;;  %v719_v53 = vmax.f32 %v1243_v54, %v633_v40  ;;  %v635_v63 = vpop.f32.mrb[31].mxu0  ;;  %v688_v10 = vpop.f32.mrb[31].mxu1 }
 0x11a   :  { %v786_v29 = vmax.f32 %v770_v20, 0.0  ;;  %v721_v62 = vmax.f32 %v1245_v55, %v686_v50  ;;  %800 = vst [vmem:[%s1340_s3 + $0x28] sm:$0xff] %v784_v24  ;;  %v1347_v2 = vmax.f32 %v1171_v4, %v1211_v30  ;;  %v1348_v3 = vmax.f32 %v1173_v5, %v1213_v31  ;;  %v761_v59 = vpop.permute.xlu1 %760 }
 0x11b   :  { %v731_v58 = vmax.f32 %v1345_v51, %v715_v22  ;;  %v733_v52 = vmax.f32 %v1346_v61, %v717_v23  ;;  %v720_v54 = vmax.f32 %v1247_v56, %v635_v63  ;;  %v722_v55 = vmax.f32 %v1249_v57, %v688_v10  ;;  %v1352_v56 = vld [vmem:[#allocation2_spill] sm:$0xff] }
 0x11c   :  { %802 = vst [vmem:[%s1340_s3 + $0x38] sm:$0xff] %v786_v29  ;;  %v732_v26 = vmax.f32 %v1347_v2, %v716_v37  ;;  %v734_v27 = vmax.f32 %v1348_v3, %v718_v39  ;;  %v1349_v15 = vmax.f32 %v1175_v6, %v1219_v34  ;;  %v1350_v19 = vmax.f32 %v1177_v7, %v1221_v35 }
 0x11d   :  { %v771_v11 = vadd.f32 %v756_v33, %v731_v58  ;;  %v773_v14 = vadd.f32 %v756_v33, %v733_v52  ;;  %v1351_v5 = vmax.f32 %v1179_v8, %v1227_v38  ;;  %v1353_v43 = vmax.f32 %v1181_v9, %v1352_v56 }
 0x11e   :  { %v735_v18 = vmax.f32 %v1349_v15, %v719_v53  ;;  %v737_v42 = vmax.f32 %v1350_v19, %v721_v62  ;;  %v772_v4 = vadd.f32 %v756_v33, %v732_v26  ;;  %v774_v30 = vadd.f32 %v756_v33, %v734_v27 }
 0x11f   :  { %v736_v31 = vmax.f32 %v1351_v5, %v720_v54  ;;  %v738_v57 = vmax.f32 %v1353_v43, %v722_v55  ;;  %v787_v60 = vmax.f32 %v771_v11, 0.0  ;;  %v789_v44 = vmax.f32 %v773_v14, 0.0 }
 0x120   :  { %v775_v45 = vadd.f32 %v761_v59, %v735_v18  ;;  %v777_v6 = vadd.f32 %v761_v59, %v737_v42  ;;  %v788_v34 = vmax.f32 %v772_v4, 0.0  ;;  %v790_v12 = vmax.f32 %v774_v30, 0.0 }
 0x121   :  { %v776_v13 = vadd.f32 %v761_v59, %v736_v31  ;;  %v778_v7 = vadd.f32 %v761_v59, %v738_v57  ;;  %803 = vst [vmem:[%s1340_s3 + $0x40] sm:$0xff] %v787_v60  ;;  %805 = vst [vmem:[%s1340_s3 + $0x50] sm:$0xff] %v789_v44 }
 0x122   :  { %v791_v8 = vmax.f32 %v775_v45, 0.0  ;;  %v793_v9 = vmax.f32 %v777_v6, 0.0  ;;  %804 = vst [vmem:[%s1340_s3 + $0x48] sm:$0xff] %v788_v34  ;;  %806 = vst [vmem:[%s1340_s3 + $0x58] sm:$0xff] %v790_v12 }
 0x123   :  { %v792_v35 = vmax.f32 %v776_v13, 0.0  ;;  %v794_v38 = vmax.f32 %v778_v7, 0.0 }
 0x124   :  { %807 = vst [vmem:[%s1340_s3 + $0x60] sm:$0xff] %v791_v8  ;;  %809 = vst [vmem:[%s1340_s3 + $0x70] sm:$0xff] %v793_v9 }
 0x125   :  { %808 = vst [vmem:[%s1340_s3 + $0x68] sm:$0xff] %v792_v35  ;;  %810 = vst [vmem:[%s1340_s3 + $0x78] sm:$0xff] %v794_v38 }

// kernel: simple_cnn_forward.4
= control target key start
LH: loop header
LB: loop body
LE: loop exit
PB: predicated region body
PF: predicated region fallthrough
CT: control target
= control target key end

     0   :  { %v1834_v1 = vmov 0   ;;  %vm235_vm0 = vcmask 261120   ;;  %s2339_s0 = inlined_call_operand.vmem [shape: bf16[4,288,128], index: 0, kind: input, shape index: {}]   ;;  %s2340_s1 = inlined_call_operand.vmem [shape: bf16[64,288], index: 1, kind: input, shape index: {}]   ;;  %s2341_s2 = inlined_call_operand.vmem [shape: f32[64,1], index: 2, kind: input, shape index: {}]   ;;  %s2342_s3 = inlined_call_operand.vmem [shape: f32[64,128], index: 3, kind: output, shape index: {}]  }
   0x1   :  { %v1746_v0 = vld [vmem:[%s2339_s0 + $0x40] sm:$0xff]   ;;  %1745 = vset.pattern.permute.xlu1 %v1834_v1  ;;  %1744 = vset.pattern.permute.xlu0 %v1834_v1  ;;  %v1747_v2 = vld [vmem:[%s2339_s0 + $0xd0] sm:$0xff]   ;;  %v1750_v5 = vld [vmem:[%s2339_s0 + $0x48] sm:$0xff]  }
   0x2   :  { %1511 = vmatprep.subr.bf16.mxu0 %v1746_v0  ;;  %v1748_v3 = vld [vmem:[%s2339_s0] sm:$0xff]   ;;  %1557 = vmatprep.subr.bf16.mxu1 %v1747_v2  ;;  %v1749_v4 = vld [vmem:[%s2339_s0 + $0x90] sm:$0xff]   ;;  %v1751_v6 = vld [vmem:[%s2339_s0 + $0xd8] sm:$0xff]  }
   0x3   :  { %1512 = vmatpush3.bf16.msra.mxu0 %v1748_v3  ;;  %1558 = vmatpush3.bf16.msra.mxu1 %v1749_v4  ;;  %v1752_v7 = vld [vmem:[%s2339_s0 + $0x8] sm:$0xff]   ;;  %v1753_v8 = vld [vmem:[%s2339_s0 + $0x98] sm:$0xff]   ;;  %v1754_v9 = vld [vmem:[%s2339_s0 + $0x50] sm:$0xff]  }
   0x4   :  { %1513 = vmatprep.subr.bf16.mxu0 %v1750_v5  ;;  %1559 = vmatprep.subr.bf16.mxu1 %v1751_v6  ;;  %v1755_v10 = vld [vmem:[%s2339_s0 + $0xe0] sm:$0xff]   ;;  %v1756_v11 = vld [vmem:[%s2339_s0 + $0x10] sm:$0xff]   ;;  %v1758_v13 = vld [vmem:[%s2339_s0 + $0x58] sm:$0xff]  }
   0x5   :  { %v1757_v12 = vld [vmem:[%s2339_s0 + $0xa0] sm:$0xff]   ;;  %v1759_v14 = vld [vmem:[%s2339_s0 + $0xe8] sm:$0xff]   ;;  %v1760_v15 = vld [vmem:[%s2339_s0 + $0x18] sm:$0xff]  }
   0x6   :  { %v1761_v16 = vld [vmem:[%s2339_s0 + $0xa8] sm:$0xff]   ;;  %v1762_v17 = vld [vmem:[%s2339_s0 + $0x60] sm:$0xff]   ;;  %v1763_v18 = vld [vmem:[%s2339_s0 + $0xf0] sm:$0xff]  }
   0x7   :  { %1514 = vmatpush3.bf16.msra.mxu0 %v1752_v7  ;;  %1560 = vmatpush3.bf16.msra.mxu1 %v1753_v8  ;;  %v1764_v19 = vld [vmem:[%s2339_s0 + $0x20] sm:$0xff]   ;;  %v1765_v20 = vld [vmem:[%s2339_s0 + $0xb0] sm:$0xff]   ;;  %v1766_v21 = vld [vmem:[%s2339_s0 + $0x68] sm:$0xff]  }
   0x8   :  { %1515 = vmatprep.subr.bf16.mxu0 %v1754_v9  ;;  %1561 = vmatprep.subr.bf16.mxu1 %v1755_v10  ;;  %v1767_v22 = vld [vmem:[%s2339_s0 + $0xf8] sm:$0xff]   ;;  %v1768_v23 = vld [vmem:[%s2339_s0 + $0x28] sm:$0xff]   ;;  %v1770_v25 = vld [vmem:[%s2339_s0 + $0x70] sm:$0xff]  }
   0x9   :  { %v1769_v24 = vld [vmem:[%s2339_s0 + $0xb8] sm:$0xff]   ;;  %v1771_v26 = vld [vmem:[%s2339_s0 + $0x100] sm:$0xff]   ;;  %v1772_v27 = vld [vmem:[%s2339_s0 + $0x30] sm:$0xff]  }
   0xa   :  { %v1773_v28 = vld [vmem:[%s2339_s0 + $0xc0] sm:$0xff]   ;;  %v1774_v29 = vld [vmem:[%s2339_s0 + $0x78] sm:$0xff]   ;;  %v1775_v30 = vld [vmem:[%s2339_s0 + $0x108] sm:$0xff]  }
   0xb   :  { %1516 = vmatpush3.bf16.msra.mxu0 %v1756_v11  ;;  %1562 = vmatpush3.bf16.msra.mxu1 %v1757_v12  ;;  %v1776_v31 = vld [vmem:[%s2339_s0 + $0x38] sm:$0xff]   ;;  %v1777_v32 = vld [vmem:[%s2339_s0 + $0xc8] sm:$0xff]   ;;  %v1954_v33 = vld [vmem:[%s2340_s1 + $0x4] ss:$12 sps:$4 sm:$0xff]  }
   0xc   :  { %1517 = vmatprep.subr.bf16.mxu0 %v1758_v13  ;;  %1563 = vmatprep.subr.bf16.mxu1 %v1759_v14  ;;  %v1959_v34 = vld [vmem:[%s2340_s1] ss:$12 sps:$4 sm:$0xff]   ;;  %v1983_v40 = vld [vmem:[%s2340_s1 + $0x1c] ss:$12 sps:$4 sm:$0xff]   ;;  %v1988_v41 = vld [vmem:[%s2340_s1 + $0x18] ss:$12 sps:$4 sm:$0xff]  }
   0xd   :  { %280 = vmatprep.mubr.bf16.mxu0 %v1954_v33  ;;  %555 = vmatprep.mubr.bf16.mxu1 %v1954_v33  ;;  %v1781_v35 = vld [vmem:[%s2339_s0 + $0x160] sm:$0xff]   ;;  %v1784_v38 = vld [vmem:[%s2339_s0 + $0x168] sm:$0xff]   ;;  %v1789_v42 = vld [vmem:[%s2339_s0 + $0x170] sm:$0xff]  }
   0xe   :  { %v1782_v36 = vld [vmem:[%s2339_s0 + $0x120] sm:$0xff]   ;;  %v1785_v39 = vld [vmem:[%s2339_s0 + $0x128] sm:$0xff]   ;;  %v1790_v43 = vld [vmem:[%s2339_s0 + $0x130] sm:$0xff]  }
   0xf   :  { %1518 = vmatpush3.bf16.msra.mxu0 %v1760_v15  ;;  %1564 = vmatpush3.bf16.msra.mxu1 %v1761_v16  ;;  %v1783_v37 = vld [vmem:[%s2339_s0 + $0x80] sm:$0xff]   ;;  %v1791_v44 = vld [vmem:[%s2339_s0 + $0x178] sm:$0xff]   ;;  %v1798_v49 = vld [vmem:[%s2339_s0 + $0x88] sm:$0xff]  }
  0x10   :  { %1519 = vmatprep.subr.bf16.mxu0 %v1762_v17  ;;  %1565 = vmatprep.subr.bf16.mxu1 %v1763_v18  ;;  %v1792_v45 = vld [vmem:[%s2339_s0 + $0x138] sm:$0xff]   ;;  %v2009_v46 = vld [vmem:[%s2340_s1 + $0x34] ss:$12 sps:$4 sm:$0xff]   ;;  %v1799_v51 = vld [vmem:[%s2339_s0 + $0x188] sm:$0xff]  }
  0x11   :  { %v2014_v47 = vld [vmem:[%s2340_s1 + $0x30] ss:$12 sps:$4 sm:$0xff]   ;;  %v1796_v48 = vld [vmem:[%s2339_s0 + $0x180] sm:$0xff]   ;;  %v2033_v52 = vld [vmem:[%s2340_s1 + $0x4c] ss:$12 sps:$4 sm:$0xff]  }
  0x12   :  { %v1797_v50 = vld [vmem:[%s2339_s0 + $0x140] sm:$0xff]   ;;  %v1800_v53 = vld [vmem:[%s2339_s0 + $0x148] sm:$0xff]   ;;  %v1804_v54 = vld [vmem:[%s2339_s0 + $0x190] sm:$0xff]  }
  0x13   :  { %1520 = vmatpush3.bf16.msra.mxu0 %v1764_v19  ;;  %1566 = vmatpush3.bf16.msra.mxu1 %v1765_v20  ;;  %v2048_v55 = vld [vmem:[%s2340_s1 + $0x48] ss:$12 sps:$4 sm:$0xff]   ;;  %v1806_v58 = vld [vmem:[%s2339_s0 + $0x198] sm:$0xff]   ;;  %v2078_v62 = vld [vmem:[%s2340_s1 + $0x20] ss:$12 sps:$4 sm:$0xff]  }
  0x14   :  { %1521 = vmatprep.subr.bf16.mxu0 %v1766_v21  ;;  %1567 = vmatprep.subr.bf16.mxu1 %v1767_v22  ;;  %v2053_v56 = vld [vmem:[%s2340_s1 + $0x8] ss:$12 sps:$4 sm:$0xff]   ;;  %v1807_v60 = vld [vmem:[%s2339_s0 + $0x158] sm:$0xff]   ;;  %v1817_v4 = vld [vmem:[%s2339_s0 + $0x200] sm:$0xff]  }
  0x15   :  { %v1805_v57 = vld [vmem:[%s2339_s0 + $0x150] sm:$0xff]   ;;  %v2086_v0 = vld [vmem:[%s2340_s1 + $0x38] ss:$12 sps:$4 sm:$0xff]   ;;  %v1820_v8 = vld [vmem:[%s2339_s0 + $0x208] sm:$0xff]  }
  0x16   :  { %v1812_v59 = vld [vmem:[%s2339_s0 + $0x110] sm:$0xff]   ;;  %v1813_v1 = vld [vmem:[%s2339_s0 + $0x1f8] sm:$0xff]   ;;  %v1824_v6 = vld [vmem:[%s2339_s0 + $0x1a0] sm:$0xff]  }
  0x17   :  { %1522 = vmatpush3.bf16.msra.mxu0 %v1768_v23  ;;  %1568 = vmatpush3.bf16.msra.mxu1 %v1769_v24  ;;  %v1810_v61 = vld [vmem:[%s2339_s0 + $0x1f0] sm:$0xff]   ;;  %v1819_v2 = vld [vmem:[%s2339_s0 + $0x118] sm:$0xff]   ;;  %v1818_v7 = vld [vmem:[%s2339_s0 + $0x1c0] sm:$0xff]  }
  0x18   :  { %1523 = vmatprep.subr.bf16.mxu0 %v1770_v25  ;;  %1569 = vmatprep.subr.bf16.mxu1 %v1771_v26  ;;  %v1811_v63 = vld [vmem:[%s2339_s0 + $0x1b0] sm:$0xff]   ;;  %v1814_v3 = vld [vmem:[%s2339_s0 + $0x1b8] sm:$0xff]   ;;  %v1821_v9 = vld [vmem:[%s2339_s0 + $0x1c8] sm:$0xff]  }
  0x19   :  { %v2109_v5 = vld [vmem:[%s2340_s1 + $0x50] ss:$12 sps:$4 sm:$0xff]   ;;  %v1227_v13 = vld [vmem:[%s2341_s2] sm:$0xff]  ;;  %v1829_v15 = vld [vmem:[%s2339_s0 + $0x1a8] sm:$0xff]  }
  0x1a   :  { %v1822_v10 = vld [vmem:[%s2339_s0 + $0x210] sm:$0xff]   ;;  %v1825_v14 = vld [vmem:[%s2339_s0 + $0x218] sm:$0xff]   ;;  %1237 = vperm.xlu0 %1744, %v1227_v13   ;;  %v1228_v19 = vld [vmem:[%s2341_s2 + $0x8] sm:$0xff] }
  0x1b   :  { %1524 = vmatpush3.bf16.msra.mxu0 %v1772_v27  ;;  %1570 = vmatpush3.bf16.msra.mxu1 %v1773_v28  ;;  %v1823_v11 = vld [vmem:[%s2339_s0 + $0x1d0] sm:$0xff]   ;;  %v1230_v16 = vld [vmem:[%s2341_s2 + $0x18] sm:$0xff]  ;;  %v1827_v20 = vld [vmem:[%s2339_s0 + $0x220] sm:$0xff]  }
  0x1c   :  { %1525 = vmatprep.subr.bf16.mxu0 %v1774_v29  ;;  %1571 = vmatprep.subr.bf16.mxu1 %v1775_v30  ;;  %v1229_v12 = vld [vmem:[%s2341_s2 + $0x10] sm:$0xff]  ;;  %v1826_v17 = vld [vmem:[%s2339_s0 + $0x1d8] sm:$0xff]   ;;  %v1232_v21 = vld [vmem:[%s2341_s2 + $0x28] sm:$0xff] }
  0x1d   :  { %1247 = vperm.xlu1 %1745, %v1229_v12   ;;  %v1832_v18 = vld [vmem:[%s2339_s0 + $0x230] sm:$0xff]   ;;  %v1828_v22 = vld [vmem:[%s2339_s0 + $0x1e0] sm:$0xff]   ;;  %v1830_v23 = vld [vmem:[%s2339_s0 + $0x228] sm:$0xff]  }
  0x1e   :  { %1242 = vperm.xlu0 %1744, %v1228_v19   ;;  %v1231_v24 = vld [vmem:[%s2341_s2 + $0x20] sm:$0xff]  ;;  %v1234_v25 = vld [vmem:[%s2341_s2 + $0x38] sm:$0xff]  ;;  %v1831_v26 = vld [vmem:[%s2339_s0 + $0x1e8] sm:$0xff]  }
  0x1f   :  { %1526 = vmatpush3.bf16.msra.mxu0 %v1776_v31  ;;  %1572 = vmatpush3.bf16.msra.mxu1 %v1777_v32  ;;  %v1233_v27 = vld [vmem:[%s2341_s2 + $0x30] sm:$0xff]  ;;  %v1833_v28 = vld [vmem:[%s2339_s0 + $0x238] sm:$0xff]  }
  0x20   :  { %1603 = vmatprep.subr.bf16.mxu1 %v1781_v35  ;;  %1695 = vmatprep.subr.bf16.mxu0 %v1783_v37 }
  0x21   :  { %1252 = vperm.xlu1 %1745, %v1230_v16  }
  0x22   :  { %281 = vmatmul.mubr.bf16.vlgmr.msra.gmra.mrb[0].mxu0 %v1959_v34  ;;  %556 = vmatmul.mubr.bf16.vlgmr.msra.gmra.mrb[0].mxu1 %v1959_v34 }
  0x23   :  { %1604 = vmatpush3.bf16.msra.mxu1 %v1782_v36  ;;  %1696 = vmatpush3.bf16.msra.mxu0 %v1783_v37 }
  0x24   :  { %1605 = vmatprep.subr.bf16.mxu1 %v1784_v38  ;;  %288 = vmatprep.mubr.bf16.mxu0 %v1983_v40 }
  0x25   :  { %563 = vmatprep.mubr.bf16.mxu1 %v1983_v40  ;;  %1697 = vmatprep.subr.bf16.mxu0 %v1798_v49 }
  0x26   :  { %1262 = vperm.xlu1 %1745, %v1232_v21   ;;  %1257 = vperm.xlu0 %1744, %v1231_v24  }
  0x27   :  { %1606 = vmatpush3.bf16.msra.mxu1 %v1785_v39  ;;  %1698 = vmatpush3.bf16.msra.mxu0 %v1798_v49 }
  0x28   :  { %1607 = vmatprep.subr.bf16.mxu1 %v1789_v42  ;;  %1707 = vmatprep.subr.bf16.mxu0 %v1812_v59 }
  0x2a   :  { %289 = vmatmul.mubr.bf16.gmra.mrb[4].mxu0 %v1988_v41  ;;  %564 = vmatmul.mubr.bf16.gmra.mrb[4].mxu1 %v1988_v41 }
  0x2b   :  { %1608 = vmatpush3.bf16.msra.mxu1 %v1790_v43  ;;  %296 = vmatprep.mubr.bf16.mxu0 %v2009_v46 }
  0x2c   :  { %1609 = vmatprep.subr.bf16.mxu1 %v1791_v44  ;;  %571 = vmatprep.mubr.bf16.mxu1 %v2009_v46 }
  0x2d   :  { %1272 = vperm.xlu1 %1745, %v1234_v25   ;;  %1267 = vperm.xlu0 %1744, %v1233_v27  }
  0x2f   :  { %1610 = vmatpush3.bf16.msra.mxu1 %v1792_v45 }
  0x30   :  { %1611 = vmatprep.subr.bf16.mxu1 %v1796_v48 }
  0x32   :  { %297 = vmatmul.mubr.bf16.gmra.mrb[8].mxu0 %v2014_v47  ;;  %572 = vmatmul.mubr.bf16.gmra.mrb[8].mxu1 %v2014_v47 }
  0x33   :  { %304 = vmatprep.mubr.bf16.mxu0 %v2033_v52  ;;  %1612 = vmatpush3.bf16.msra.mxu1 %v1797_v50 }
  0x34   :  { %579 = vmatprep.mubr.bf16.mxu1 %v2033_v52  ;;  %1613 = vmatprep.subr.bf16.mxu1 %v1799_v51 }
  0x37   :  { %1614 = vmatpush3.bf16.msra.mxu1 %v1800_v53 }
  0x38   :  { %1615 = vmatprep.subr.bf16.mxu1 %v1804_v54 }
  0x3a   :  { %305 = vmatmul.mubr.bf16.gmra.mrb[12].mxu0 %v2048_v55  ;;  %580 = vmatmul.mubr.bf16.gmra.mrb[12].mxu1 %v2048_v55 }
  0x3b   :  { %1699 = vmatprep.mubr.msk.bf16.mxu0 %vm235_vm0, %v2053_v56  ;;  %1616 = vmatpush3.bf16.msra.mxu1 %v1805_v57 }
  0x3c   :  { %830 = vmatprep.mubr.bf16.mxu1 %v1954_v33  ;;  %1617 = vmatprep.subr.bf16.mxu1 %v1806_v58 }
  0x3f   :  { %1618 = vmatpush3.bf16.msra.mxu1 %v1807_v60 }
  0x40   :  { %1649 = vmatprep.subr.bf16.mxu1 %v1810_v61 }
  0x42   :  { %1700 = vmatmul.mubr.msk.bf16.vlgmr.msra.gmra.mrb[16].mxu0 %vm235_vm0, %v2078_v62  ;;  %831 = vmatmul.mubr.bf16.vlgmr.msra.gmra.mrb[16].mxu1 %v1959_v34 }
  0x43   :  { %1708 = vmatpush3.bf16.msra.mxu0 %v1812_v59  ;;  %1650 = vmatpush3.bf16.msra.mxu1 %v1811_v63 }
  0x44   :  { %1703 = vmatprep.mubr.msk.bf16.mxu0 %vm235_vm0, %v2086_v0  ;;  %1651 = vmatprep.subr.bf16.mxu1 %v1813_v1 }
  0x45   :  { %838 = vmatprep.mubr.bf16.mxu1 %v1983_v40  ;;  %1709 = vmatprep.subr.bf16.mxu0 %v1819_v2 }
  0x47   :  { %1710 = vmatpush3.bf16.msra.mxu0 %v1819_v2  ;;  %1652 = vmatpush3.bf16.msra.mxu1 %v1814_v3 }
  0x48   :  { %1653 = vmatprep.subr.bf16.mxu1 %v1817_v4  ;;  %1719 = vmatprep.subr.bf16.mxu0 %v1824_v6 }
  0x4a   :  { %1704 = vmatmul.mubr.msk.bf16.gmra.mrb[20].mxu0 %vm235_vm0, %v2109_v5  ;;  %839 = vmatmul.mubr.bf16.gmra.mrb[20].mxu1 %v1988_v41 }
  0x4b   :  { %1711 = vmatprep.mubr.msk.bf16.mxu0 %vm235_vm0, %v2053_v56  ;;  %1654 = vmatpush3.bf16.msra.mxu1 %v1818_v7 }
  0x4c   :  { %846 = vmatprep.mubr.bf16.mxu1 %v2009_v46  ;;  %1655 = vmatprep.subr.bf16.mxu1 %v1820_v8 }
  0x4f   :  { %1656 = vmatpush3.bf16.msra.mxu1 %v1821_v9 }
  0x50   :  { %1657 = vmatprep.subr.bf16.mxu1 %v1822_v10 }
  0x52   :  { %1712 = vmatmul.mubr.msk.bf16.vlgmr.msra.gmra.mrb[24].mxu0 %vm235_vm0, %v2078_v62  ;;  %847 = vmatmul.mubr.bf16.gmra.mrb[24].mxu1 %v2014_v47 }
  0x53   :  { %1720 = vmatpush3.bf16.msra.mxu0 %v1824_v6  ;;  %1658 = vmatpush3.bf16.msra.mxu1 %v1823_v11 }
  0x54   :  { %1715 = vmatprep.mubr.msk.bf16.mxu0 %vm235_vm0, %v2086_v0  ;;  %1659 = vmatprep.subr.bf16.mxu1 %v1825_v14 }
  0x55   :  { %854 = vmatprep.mubr.bf16.mxu1 %v2033_v52  ;;  %1721 = vmatprep.subr.bf16.mxu0 %v1829_v15 }
  0x57   :  { %1722 = vmatpush3.bf16.msra.mxu0 %v1829_v15  ;;  %1660 = vmatpush3.bf16.msra.mxu1 %v1826_v17 }
  0x58   :  { %1731 = vmatprep.subr.bf16.mxu0 %v1832_v18  ;;  %1661 = vmatprep.subr.bf16.mxu1 %v1827_v20 }
  0x5a   :  { %1716 = vmatmul.mubr.msk.bf16.gmra.mrb[28].mxu0 %vm235_vm0, %v2109_v5  ;;  %855 = vmatmul.mubr.bf16.gmra.mrb[28].mxu1 %v2048_v55 }
  0x5b   :  { %1723 = vmatprep.mubr.msk.bf16.mxu0 %vm235_vm0, %v2053_v56  ;;  %1662 = vmatpush3.bf16.msra.mxu1 %v1828_v22 }
  0x5c   :  { %1105 = vmatprep.mubr.bf16.mxu1 %v1954_v33  ;;  %1663 = vmatprep.subr.bf16.mxu1 %v1830_v23 }
  0x5f   :  { %1664 = vmatpush3.bf16.msra.mxu1 %v1831_v26 }
  0x62   :  { %1724 = vmatmul.mubr.msk.bf16.vlgmr.msra.gmra.mrb[32].mxu0 %vm235_vm0, %v2078_v62  ;;  %1106 = vmatmul.mubr.bf16.vlgmr.msra.gmra.mrb[32].mxu1 %v1959_v34 }
  0x63   :  { %1732 = vmatpush3.bf16.msra.mxu0 %v1832_v18  ;;  %1727 = vmatprep.mubr.msk.bf16.mxu0 %vm235_vm0, %v2086_v0 }
  0x64   :  { %1113 = vmatprep.mubr.bf16.mxu1 %v1983_v40  ;;  %1733 = vmatprep.subr.bf16.mxu0 %v1833_v28 }
  0x67   :  { %1734 = vmatpush3.bf16.msra.mxu0 %v1833_v28 }
  0x6a   :  { %1728 = vmatmul.mubr.msk.bf16.gmra.mrb[36].mxu0 %vm235_vm0, %v2109_v5  ;;  %1114 = vmatmul.mubr.bf16.gmra.mrb[36].mxu1 %v1988_v41 }
  0x6b   :  { %1735 = vmatprep.mubr.msk.bf16.mxu0 %vm235_vm0, %v2053_v56  ;;  %1121 = vmatprep.mubr.bf16.mxu1 %v2009_v46 }
  0x72   :  { %1736 = vmatmul.mubr.msk.bf16.vlgmr.msra.gmra.mrb[40].mxu0 %vm235_vm0, %v2078_v62  ;;  %1122 = vmatmul.mubr.bf16.gmra.mrb[40].mxu1 %v2014_v47 }
  0x73   :  { %1739 = vmatprep.mubr.msk.bf16.mxu0 %vm235_vm0, %v2086_v0  ;;  %1129 = vmatprep.mubr.bf16.mxu1 %v2033_v52 }
  0x7a   :  { %1740 = vmatmul.mubr.msk.bf16.gmra.mrb[44].mxu0 %vm235_vm0, %v2109_v5  ;;  %1130 = vmatmul.mubr.bf16.gmra.mrb[44].mxu1 %v2048_v55 }
  0xf5   :  { %v1527_v29 = vpop.f32.mrb[0].mxu0  ;;  %v1573_v30 = vpop.f32.mrb[0].mxu1 }
  0xf6   :  { %v1528_v31 = vpop.f32.mrb[1].mxu0  ;;  %v1574_v33 = vpop.f32.mrb[1].mxu1 }
  0xf7   :  { %v1529_v32 = vadd.f32 %v1528_v31, %v1527_v29  ;;  %v1530_v34 = vpop.f32.mrb[2].mxu0  ;;  %v2219_v35 = vadd.f32 %v1574_v33, %v1573_v30  ;;  %v1576_v36 = vpop.f32.mrb[2].mxu1 }
  0xf8   :  { %v1531_v37 = vpop.f32.mrb[3].mxu0  ;;  %v1577_v39 = vpop.f32.mrb[3].mxu1 }
  0xf9   :  { %v1532_v38 = vadd.f32 %v1531_v37, %v1530_v34  ;;  %v2221_v40 = vadd.f32 %v1577_v39, %v1576_v36 }
  0xfd   :  { %v1533_v41 = vpop.f32.mrb[4].mxu0  ;;  %v1579_v42 = vpop.f32.mrb[4].mxu1 }
  0xfe   :  { %v1534_v43 = vpop.f32.mrb[5].mxu0  ;;  %v1580_v45 = vpop.f32.mrb[5].mxu1 }
  0xff   :  { %v1535_v44 = vadd.f32 %v1534_v43, %v1533_v41  ;;  %v1536_v46 = vpop.f32.mrb[6].mxu0  ;;  %v1581_v47 = vadd.f32 %v1580_v45, %v1579_v42  ;;  %v1582_v48 = vpop.f32.mrb[6].mxu1 }
 0x100   :  { %v1537_v49 = vpop.f32.mrb[7].mxu0  ;;  %v1583_v51 = vpop.f32.mrb[7].mxu1 }
 0x101   :  { %v1538_v50 = vadd.f32 %v1537_v49, %v1536_v46  ;;  %v1584_v52 = vadd.f32 %v1583_v51, %v1582_v48 }
 0x105   :  { %v1539_v53 = vpop.f32.mrb[8].mxu0  ;;  %v1585_v54 = vpop.f32.mrb[8].mxu1 }
 0x106   :  { %v1540_v55 = vpop.f32.mrb[9].mxu0  ;;  %v1586_v57 = vpop.f32.mrb[9].mxu1 }
 0x107   :  { %v1541_v56 = vadd.f32 %v1540_v55, %v1539_v53  ;;  %v1542_v58 = vpop.f32.mrb[10].mxu0  ;;  %v2223_v59 = vadd.f32 %v1586_v57, %v1585_v54  ;;  %v1588_v60 = vpop.f32.mrb[10].mxu1 }
 0x108   :  { %v1543_v61 = vpop.f32.mrb[11].mxu0  ;;  %v1589_v63 = vpop.f32.mrb[11].mxu1 }
 0x109   :  { %v1544_v62 = vadd.f32 %v1543_v61, %v1542_v58  ;;  %v2225_v0 = vadd.f32 %v1589_v63, %v1588_v60 }
 0x10d   :  { %v1545_v1 = vpop.f32.mrb[12].mxu0  ;;  %v1591_v2 = vpop.f32.mrb[12].mxu1 }
 0x10e   :  { %v1546_v3 = vpop.f32.mrb[13].mxu0  ;;  %v1592_v5 = vpop.f32.mrb[13].mxu1 }
 0x10f   :  { %v1547_v4 = vadd.f32 %v1546_v3, %v1545_v1  ;;  %v1548_v6 = vpop.f32.mrb[14].mxu0  ;;  %v1593_v7 = vadd.f32 %v1592_v5, %v1591_v2  ;;  %v1594_v8 = vpop.f32.mrb[14].mxu1 }
 0x110   :  { %v1549_v9 = vpop.f32.mrb[15].mxu0  ;;  %v1595_v11 = vpop.f32.mrb[15].mxu1 }
 0x111   :  { %v1550_v10 = vadd.f32 %v1549_v9, %v1548_v6  ;;  %v1596_v12 = vadd.f32 %v1595_v11, %v1594_v8 }
 0x115   :  { %v1701_v13 = vpop.f32.mrb[16].mxu0  ;;  %v1619_v15 = vpop.f32.mrb[16].mxu1 }
 0x116   :  { %v2227_v14 = vadd.f32 %v1701_v13, %v1535_v44  ;;  %v347_v16 = vpop.f32.mrb[17].mxu0  ;;  %v1620_v18 = vpop.f32.mrb[17].mxu1 }
 0x117   :  { %v2229_v17 = vadd.f32 %v1529_v32, %v347_v16  ;;  %v1702_v19 = vpop.f32.mrb[18].mxu0  ;;  %v1621_v20 = vadd.f32 %v1620_v18, %v1619_v15  ;;  %v1622_v22 = vpop.f32.mrb[18].mxu1 }
 0x118   :  { %v2231_v21 = vadd.f32 %v1702_v19, %v1538_v50  ;;  %v350_v23 = vpop.f32.mrb[19].mxu0  ;;  %v1623_v25 = vpop.f32.mrb[19].mxu1 }
 0x119   :  { %v2233_v24 = vadd.f32 %v1532_v38, %v350_v23  ;;  %v1624_v26 = vadd.f32 %v1623_v25, %v1622_v22 }
 0x11d   :  { %v1705_v27 = vpop.f32.mrb[20].mxu0  ;;  %v1625_v29 = vpop.f32.mrb[20].mxu1 }
 0x11e   :  { %v2235_v28 = vadd.f32 %v1705_v27, %v1547_v4  ;;  %v363_v30 = vpop.f32.mrb[21].mxu0  ;;  %v1626_v32 = vpop.f32.mrb[21].mxu1 }
 0x11f   :  { %v2237_v31 = vadd.f32 %v1541_v56, %v363_v30  ;;  %v1706_v33 = vpop.f32.mrb[22].mxu0  ;;  %v1627_v34 = vadd.f32 %v1626_v32, %v1625_v29  ;;  %v1628_v37 = vpop.f32.mrb[22].mxu1 }
 0x120   :  { %v2239_v36 = vadd.f32 %v1706_v33, %v1550_v10  ;;  %v366_v39 = vpop.f32.mrb[23].mxu0  ;;  %v1629_v38 = vpop.f32.mrb[23].mxu1 }
 0x121   :  { %v2241_v41 = vadd.f32 %v1544_v62, %v366_v39  ;;  %v1630_v42 = vadd.f32 %v1629_v38, %v1628_v37 }
 0x125   :  { %v1713_v43 = vpop.f32.mrb[24].mxu0  ;;  %v1631_v45 = vpop.f32.mrb[24].mxu1 }
 0x126   :  { %v2243_v44 = vadd.f32 %v1713_v43, %v1581_v47  ;;  %v622_v46 = vpop.f32.mrb[25].mxu0  ;;  %v1632_v49 = vpop.f32.mrb[25].mxu1 }
 0x127   :  { %v2246_v48 = vadd.f32 %v2219_v35, %v622_v46  ;;  %v1714_v50 = vpop.f32.mrb[26].mxu0  ;;  %v1633_v53 = vadd.f32 %v1632_v49, %v1631_v45  ;;  %v1634_v55 = vpop.f32.mrb[26].mxu1 }
 0x128   :  { %v1205_v51 = vmax.f32 %v2227_v14, %v2243_v44  ;;  %v2250_v54 = vadd.f32 %v1714_v50, %v1584_v52  ;;  %v625_v56 = vpop.f32.mrb[27].mxu0  ;;  %v1635_v58 = vpop.f32.mrb[27].mxu1 }
 0x129   :  { %v1203_v57 = vmax.f32 %v2229_v17, %v2246_v48  ;;  %v2255_v47 = vadd.f32 %v2221_v40, %v625_v56  ;;  %v1636_v60 = vadd.f32 %v1635_v58, %v1634_v55 }
 0x12a   :  { %v1206_v35 = vmax.f32 %v2231_v21, %v2250_v54 }
 0x12b   :  { %v1204_v61 = vmax.f32 %v2233_v24, %v2255_v47 }
 0x12d   :  { %v1717_v62 = vpop.f32.mrb[28].mxu0  ;;  %v1637_v52 = vpop.f32.mrb[28].mxu1 }
 0x12e   :  { %v2261_v63 = vadd.f32 %v1717_v62, %v1593_v7  ;;  %v638_v1 = vpop.f32.mrb[29].mxu0  ;;  %v1638_v3 = vpop.f32.mrb[29].mxu1 }
 0x12f   :  { %v2264_v2 = vadd.f32 %v2223_v59, %v638_v1  ;;  %v1718_v4 = vpop.f32.mrb[30].mxu0  ;;  %v1639_v5 = vadd.f32 %v1638_v3, %v1637_v52  ;;  %v1640_v8 = vpop.f32.mrb[30].mxu1 }
 0x130   :  { %v1209_v40 = vmax.f32 %v2235_v28, %v2261_v63  ;;  %v2268_v6 = vadd.f32 %v1718_v4, %v1596_v12  ;;  %v641_v9 = vpop.f32.mrb[31].mxu0  ;;  %v1641_v11 = vpop.f32.mrb[31].mxu1 }
 0x131   :  { %v1207_v10 = vmax.f32 %v2237_v31, %v2264_v2  ;;  %v2273_v7 = vadd.f32 %v2225_v0, %v641_v9  ;;  %v1642_v13 = vadd.f32 %v1641_v11, %v1640_v8  ;;  %v1248_v62 = vpop.permute.xlu1 %1247  ;;  %v1238_v52 = vpop.permute.xlu0 %1237 }
 0x132   :  { %v1210_v59 = vmax.f32 %v2239_v36, %v2268_v6 }
 0x133   :  { %v1208_v15 = vmax.f32 %v2241_v41, %v2273_v7 }
 0x135   :  { %v1725_v16 = vpop.f32.mrb[32].mxu0  ;;  %v1665_v12 = vpop.f32.mrb[32].mxu1 }
 0x136   :  { %v906_v18 = vadd.f32 %v1725_v16, %v1627_v34  ;;  %v897_v19 = vpop.f32.mrb[33].mxu0  ;;  %v1666_v23 = vpop.f32.mrb[33].mxu1 }
 0x137   :  { %v898_v22 = vadd.f32 %v1621_v20, %v897_v19  ;;  %v1726_v25 = vpop.f32.mrb[34].mxu0  ;;  %v1667_v27 = vadd.f32 %v1666_v23, %v1665_v12  ;;  %v1668_v30 = vpop.f32.mrb[34].mxu1 }
 0x138   :  { %v909_v29 = vadd.f32 %v1726_v25, %v1630_v42  ;;  %v900_v0 = vpop.f32.mrb[35].mxu0  ;;  %v1669_v33 = vpop.f32.mrb[35].mxu1 }
 0x139   :  { %v901_v32 = vadd.f32 %v1624_v26, %v900_v0  ;;  %v1670_v37 = vadd.f32 %v1669_v33, %v1668_v30 }
 0x13d   :  { %v1729_v39 = vpop.f32.mrb[36].mxu0  ;;  %v1671_v43 = vpop.f32.mrb[36].mxu1 }
 0x13e   :  { %v2279_v38 = vadd.f32 %v1729_v39, %v1639_v5  ;;  %v913_v45 = vpop.f32.mrb[37].mxu0  ;;  %v1672_v34 = vpop.f32.mrb[37].mxu1 }
 0x13f   :  { %v2281_v46 = vadd.f32 %v1633_v53, %v913_v45  ;;  %v1730_v49 = vpop.f32.mrb[38].mxu0  ;;  %v1673_v50 = vadd.f32 %v1672_v34, %v1671_v43  ;;  %v1674_v55 = vpop.f32.mrb[38].mxu1 }
 0x140   :  { %v2283_v20 = vadd.f32 %v1730_v49, %v1642_v13  ;;  %v916_v56 = vpop.f32.mrb[39].mxu0  ;;  %v1675_v58 = vpop.f32.mrb[39].mxu1 }
 0x141   :  { %v2285_v42 = vadd.f32 %v1636_v60, %v916_v56  ;;  %v1676_v26 = vadd.f32 %v1675_v58, %v1674_v55  ;;  %v1243_v39 = vpop.permute.xlu0 %1242 }
 0x145   :  { %v1737_v1 = vpop.f32.mrb[40].mxu0  ;;  %v1677_v3 = vpop.f32.mrb[40].mxu1 }
 0x146   :  { %v1181_v4 = vadd.f32 %v1737_v1, %v1673_v50  ;;  %v1172_v5 = vpop.f32.mrb[41].mxu0  ;;  %v1678_v8 = vpop.f32.mrb[41].mxu1 }
 0x147   :  { %v1173_v53 = vadd.f32 %v1667_v27, %v1172_v5  ;;  %v1738_v9 = vpop.f32.mrb[42].mxu0  ;;  %v1679_v16 = vadd.f32 %v1678_v8, %v1677_v3  ;;  %v1680_v12 = vpop.f32.mrb[42].mxu1 }
 0x148   :  { %v1213_v11 = vmax.f32 %v906_v18, %v1181_v4  ;;  %v1184_v13 = vadd.f32 %v1738_v9, %v1676_v26  ;;  %v1175_v19 = vpop.f32.mrb[43].mxu0  ;;  %v1681_v25 = vpop.f32.mrb[43].mxu1 }
 0x149   :  { %v1211_v23 = vmax.f32 %v898_v22, %v1173_v53  ;;  %v1176_v60 = vadd.f32 %v1670_v37, %v1175_v19  ;;  %v1682_v33 = vadd.f32 %v1681_v25, %v1680_v12  ;;  %v1253_v22 = vpop.permute.xlu1 %1252  ;;  %v1258_v47 = vpop.permute.xlu0 %1257 }
 0x14a   :  { %v1221_v30 = vmax.f32 %v1205_v51, %v1213_v11  ;;  %v1214_v0 = vmax.f32 %v909_v29, %v1184_v13 }
 0x14b   :  { %v1219_v27 = vmax.f32 %v1203_v57, %v1211_v23  ;;  %v1212_v43 = vmax.f32 %v901_v32, %v1176_v60 }
 0x14c   :  { %v1277_v18 = vadd.f32 %v1248_v62, %v1221_v30  ;;  %v1222_v45 = vmax.f32 %v1206_v35, %v1214_v0 }
 0x14d   :  { %v1275_v34 = vadd.f32 %v1238_v52, %v1219_v27  ;;  %v1220_v14 = vmax.f32 %v1204_v61, %v1212_v43  ;;  %v1741_v44 = vpop.f32.mrb[44].mxu0  ;;  %v1683_v37 = vpop.f32.mrb[44].mxu1 }
 0x14e   :  { %v1285_v51 = vmax.f32 %v1277_v18, 0.0  ;;  %v1278_v29 = vadd.f32 %v1253_v22, %v1222_v45  ;;  %v1188_v49 = vpop.f32.mrb[45].mxu0  ;;  %v1684_v48 = vpop.f32.mrb[45].mxu1 }
 0x14f   :  { %v1283_v50 = vmax.f32 %v1275_v34, 0.0  ;;  %v1276_v17 = vadd.f32 %v1243_v39, %v1220_v14  ;;  %v1189_v57 = vadd.f32 %v1679_v16, %v1188_v49  ;;  %v1742_v32 = vpop.f32.mrb[46].mxu0  ;;  %v1685_v54 = vadd.f32 %v1684_v48, %v1683_v37  ;;  %v1686_v35 = vpop.f32.mrb[46].mxu1 }
 0x150   :  { %1293 = vst [vmem:[%s2342_s3 + $0x10] sm:$0xff] %v1285_v51  ;;  %v1286_v21 = vmax.f32 %v1278_v29, 0.0  ;;  %v1191_v55 = vpop.f32.mrb[47].mxu0  ;;  %v1687_v56 = vpop.f32.mrb[47].mxu1 }
 0x151   :  { %1291 = vst [vmem:[%s2342_s3] sm:$0xff] %v1283_v50  ;;  %v1284_v24 = vmax.f32 %v1276_v17, 0.0  ;;  %v1215_v61 = vmax.f32 %v2281_v46, %v1189_v57  ;;  %v1192_v58 = vadd.f32 %v1682_v33, %v1191_v55  ;;  %v1197_v26 = vadd.f32 %v1741_v44, %v1685_v54  ;;  %v1263_v52 = vpop.permute.xlu1 %1262  ;;  %v1268_v11 = vpop.permute.xlu0 %1267 }
 0x152   :  { %1294 = vst [vmem:[%s2342_s3 + $0x18] sm:$0xff] %v1286_v21  ;;  %v1688_v62 = vadd.f32 %v1687_v56, %v1686_v35 }
 0x153   :  { %1292 = vst [vmem:[%s2342_s3 + $0x8] sm:$0xff] %v1284_v24  ;;  %v1223_v1 = vmax.f32 %v1207_v10, %v1215_v61  ;;  %v1216_v3 = vmax.f32 %v2285_v42, %v1192_v58  ;;  %v1217_v46 = vmax.f32 %v2279_v38, %v1197_v26 }
 0x154   :  { %v1200_v4 = vadd.f32 %v1742_v32, %v1688_v62 }
 0x155   :  { %v1279_v5 = vadd.f32 %v1258_v47, %v1223_v1  ;;  %v1224_v8 = vmax.f32 %v1208_v15, %v1216_v3  ;;  %v1225_v53 = vmax.f32 %v1209_v40, %v1217_v46  ;;  %v1273_v38 = vpop.permute.xlu1 %1272 }
 0x156   :  { %v1218_v9 = vmax.f32 %v2283_v20, %v1200_v4 }
 0x157   :  { %v1287_v16 = vmax.f32 %v1279_v5, 0.0  ;;  %v1280_v31 = vadd.f32 %v1263_v52, %v1224_v8  ;;  %v1281_v2 = vadd.f32 %v1268_v11, %v1225_v53 }
 0x158   :  { %v1226_v10 = vmax.f32 %v1210_v59, %v1218_v9 }
 0x159   :  { %1295 = vst [vmem:[%s2342_s3 + $0x20] sm:$0xff] %v1287_v16  ;;  %v1288_v41 = vmax.f32 %v1280_v31, 0.0  ;;  %v1289_v7 = vmax.f32 %v1281_v2, 0.0 }
 0x15a   :  { %v1282_v15 = vadd.f32 %v1273_v38, %v1226_v10 }
 0x15b   :  { %1296 = vst [vmem:[%s2342_s3 + $0x28] sm:$0xff] %v1288_v41  ;;  %1297 = vst [vmem:[%s2342_s3 + $0x30] sm:$0xff] %v1289_v7 }
 0x15c   :  { %v1290_v28 = vmax.f32 %v1282_v15, 0.0 }
 0x15e   :  { %1298 = vst [vmem:[%s2342_s3 + $0x38] sm:$0xff] %v1290_v28 }

// kernel: simple_cnn_forward.5
= control target key start
LH: loop header
LB: loop body
LE: loop exit
PB: predicated region body
PF: predicated region fallthrough
CT: control target
= control target key end

     0   :  { %10 = vsyncpa [#allocation4], 0  ;;  %s1347_s18 = smov 0   ;;  %s1528_s0 = inlined_call_operand.vmem [shape: f32[2,4096], index: 0, kind: input, shape index: {}]   ;;  %s1529_s1 = inlined_call_operand.vmem [shape: bf16[4096,256], index: 1, kind: input, shape index: {}]   ;;  %s1530_s2 = inlined_call_operand.vmem [shape: f32[1,256], index: 2, kind: input, shape index: {}]   ;;  %s1531_s3 = inlined_call_operand.vmem [shape: bf16[256,10], index: 3, kind: input, shape index: {}]   ;;  %s1532_s4 = inlined_call_operand.vmem [shape: f32[1,10], index: 4, kind: input, shape index: {}]   ;;  %s1533_s5 = inlined_call_operand.hbm [shape: f32[2,10], index: 5, kind: output, shape index: {}]  }
   0x1 LB: > { %s1353_s19 = sadd.s32 4294967295, %s1312_s18   ;;  %p1028_p0 = scmp.ge.s32.totalorder %s1312_s18, 1  ;;  %s1312_s18 = sphi %s1347_s18, %s16_s18  }
   0x2   : > { %p196_p1 = scmp.lt.s32.totalorder %s1312_s18, 9 }
   0x4   : > { %p197_p2 = pnand %p1028_p0, %p196_p1 }
   0x5   : > { %s1029_s20 = sshll.u32 (!%p197_p2), %s1353_s19, 2  ;;  %s1031_s21 = sshll.u32 (!%p197_p2), %s1353_s19, 6 }
   0x6   : > { %200 = sbr.rel (%p197_p2) target bundleno = 572 (0x23c), region = 40  ;;  %p226_p3 = scmp.lt.s32.totalorder (!%p197_p2), %s1029_s20, 31 }
   0x7   : > { %p232_p4 = scmp.lt.s32.totalorder (!%p197_p2), %s1031_s21, 511  ;;  %p1034_p5 = scmp.ne.s32.totalorder (!%p197_p2), %s1353_s19, 0 }
   0xd   : > { %s1535_s20 = smov (!%p226_p3, %s1029_s20), 31  ;;  %s1537_s21 = smov (!%p232_p4, %s1031_s21), 511 }
   0xe   : > { %s1030_s22 = sshll.u32 %s1535_s20, 1  ;;  %s1121_s26 = sshll.u32 %s1537_s21, 3  ;;  %v1314_v0 = vmov (!%p1034_p5), 0.0  }
   0xf   : > { %s1362_s25 = scalar_lea.vmem %s1528_s0, %s1030_s22  ;;  %s1367_s29 = scalar_lea.vmem %s1529_s1, %s1121_s26  ;;  %243 = vst [vmem:[#allocation2] sm:$0xf] (!%p1034_p5), %v1314_v0 }
  0x10   : > { %242 = sbr.rel (%p1034_p5) target bundleno = 23 (0x17), region = 44 }
  0x17 PF: > { %v1163_v1 = vld [vmem:[%s1367_s29 + $0x4] ss:$8 sps:$4 sm:$0xff]   ;;  %v1167_v3 = vld [vmem:[%s1367_s29] ss:$8 sps:$4 sm:$0xff]   ;;  %v1169_v5 = vld [vmem:[%s1367_s29 + $0x14] ss:$8 sps:$4 sm:$0xff]   ;;  %v251_v39 = vlaneseq }
  0x18   : > { %v1165_v2 = vld [vmem:[%s1367_s29 + $0x104] ss:$8 sps:$4 sm:$0xff]   ;;  %656 = vmatprep.subr.bf16.mxu1 %v1163_v1  ;;  %v1168_v4 = vld [vmem:[%s1367_s29 + $0x100] ss:$8 sps:$4 sm:$0xff]   ;;  %v1171_v6 = vld [vmem:[%s1367_s29 + $0x114] ss:$8 sps:$4 sm:$0xff]  }
  0x19   : > { %697 = vmatprep.subr.bf16.mxu0 %v1165_v2  ;;  %657 = vmatpush1.bf16.msra.mxu1 %v1167_v3  ;;  %v1173_v7 = vld [vmem:[%s1367_s29 + $0x10] ss:$8 sps:$4 sm:$0xff]   ;;  %v1175_v9 = vld [vmem:[%s1367_s29 + $0x24] ss:$8 sps:$4 sm:$0xff]   ;;  %v1179_v11 = vld [vmem:[%s1367_s29 + $0x20] ss:$8 sps:$4 sm:$0xff]  }
  0x1a   : > { %698 = vmatpush1.bf16.msra.mxu0 %v1168_v4  ;;  %658 = vmatprep.subr.bf16.mxu1 %v1169_v5  ;;  %v1174_v8 = vld [vmem:[%s1367_s29 + $0x110] ss:$8 sps:$4 sm:$0xff]   ;;  %v1177_v10 = vld [vmem:[%s1367_s29 + $0x124] ss:$8 sps:$4 sm:$0xff]   ;;  %v1180_v12 = vld [vmem:[%s1367_s29 + $0x120] ss:$8 sps:$4 sm:$0xff]  }
  0x1b   : > { %699 = vmatprep.subr.bf16.mxu0 %v1171_v6  ;;  %v1181_v13 = vld [vmem:[%s1367_s29 + $0x34] ss:$8 sps:$4 sm:$0xff]   ;;  %v1185_v15 = vld [vmem:[%s1367_s29 + $0x30] ss:$8 sps:$4 sm:$0xff]   ;;  %v1187_v17 = vld [vmem:[%s1367_s29 + $0x44] ss:$8 sps:$4 sm:$0xff]  }
  0x1c   : > { %v1183_v14 = vld [vmem:[%s1367_s29 + $0x134] ss:$8 sps:$4 sm:$0xff]   ;;  %v1186_v16 = vld [vmem:[%s1367_s29 + $0x130] ss:$8 sps:$4 sm:$0xff]   ;;  %v1189_v18 = vld [vmem:[%s1367_s29 + $0x144] ss:$8 sps:$4 sm:$0xff]  }
  0x1d   : > { %659 = vmatpush1.bf16.msra.mxu1 %v1173_v7  ;;  %v1191_v19 = vld [vmem:[%s1367_s29 + $0x40] ss:$8 sps:$4 sm:$0xff]   ;;  %v1193_v21 = vld [vmem:[%s1367_s29 + $0x54] ss:$8 sps:$4 sm:$0xff]   ;;  %v1197_v23 = vld [vmem:[%s1367_s29 + $0x50] ss:$8 sps:$4 sm:$0xff]  }
  0x1e   : > { %700 = vmatpush1.bf16.msra.mxu0 %v1174_v8  ;;  %660 = vmatprep.subr.bf16.mxu1 %v1175_v9  ;;  %v1192_v20 = vld [vmem:[%s1367_s29 + $0x140] ss:$8 sps:$4 sm:$0xff]   ;;  %v1195_v22 = vld [vmem:[%s1367_s29 + $0x154] ss:$8 sps:$4 sm:$0xff]   ;;  %v1198_v24 = vld [vmem:[%s1367_s29 + $0x150] ss:$8 sps:$4 sm:$0xff]  }
  0x1f   : > { %701 = vmatprep.subr.bf16.mxu0 %v1177_v10  ;;  %v1199_v25 = vld [vmem:[%s1367_s29 + $0x64] ss:$8 sps:$4 sm:$0xff]   ;;  %v1203_v27 = vld [vmem:[%s1367_s29 + $0x60] ss:$8 sps:$4 sm:$0xff]   ;;  %v1205_v29 = vld [vmem:[%s1367_s29 + $0x74] ss:$8 sps:$4 sm:$0xff]  }
  0x20   : > { %v1201_v26 = vld [vmem:[%s1367_s29 + $0x164] ss:$8 sps:$4 sm:$0xff]   ;;  %v1204_v28 = vld [vmem:[%s1367_s29 + $0x160] ss:$8 sps:$4 sm:$0xff]   ;;  %v1207_v30 = vld [vmem:[%s1367_s29 + $0x174] ss:$8 sps:$4 sm:$0xff]  }
  0x21   : > { %661 = vmatpush1.bf16.msra.mxu1 %v1179_v11  ;;  %v1209_v31 = vld [vmem:[%s1367_s29 + $0x70] ss:$8 sps:$4 sm:$0xff]   ;;  %v1211_v33 = vld [vmem:[%s1367_s29 + $0x84] ss:$8 sps:$4 sm:$0xff]   ;;  %v1215_v35 = vld [vmem:[%s1367_s29 + $0x80] ss:$8 sps:$4 sm:$0xff]  }
  0x22   : > { %702 = vmatpush1.bf16.msra.mxu0 %v1180_v12  ;;  %662 = vmatprep.subr.bf16.mxu1 %v1181_v13  ;;  %v1210_v32 = vld [vmem:[%s1367_s29 + $0x170] ss:$8 sps:$4 sm:$0xff]   ;;  %v1213_v34 = vld [vmem:[%s1367_s29 + $0x184] ss:$8 sps:$4 sm:$0xff]   ;;  %v1216_v36 = vld [vmem:[%s1367_s29 + $0x180] ss:$8 sps:$4 sm:$0xff]  }
  0x23   : > { %703 = vmatprep.subr.bf16.mxu0 %v1183_v14  ;;  %v1315_v37 = vmov 1983009808   ;;  %v1217_v40 = vld [vmem:[%s1367_s29 + $0x94] ss:$8 sps:$4 sm:$0xff]   ;;  %v1221_v42 = vld [vmem:[%s1367_s29 + $0x90] ss:$8 sps:$4 sm:$0xff]  }
  0x24   : > { %v249_v38 = vunpack.c.l.s4 %v1315_v37  ;;  %v1219_v41 = vld [vmem:[%s1367_s29 + $0x194] ss:$8 sps:$4 sm:$0xff]   ;;  %v1409_v44 = vshrl.u32 %v251_v39, 7  ;;  %v1222_v45 = vld [vmem:[%s1367_s29 + $0x190] ss:$8 sps:$4 sm:$0xff]   ;;  %v245_v53 = vld [vmem:[%s1362_s25] sm:$0xff] }
  0x25   : > { %663 = vmatpush1.bf16.msra.mxu1 %v1185_v15  ;;  %v1223_v46 = vld [vmem:[%s1367_s29 + $0xa4] ss:$8 sps:$4 sm:$0xff]   ;;  %v1227_v48 = vld [vmem:[%s1367_s29 + $0xa0] ss:$8 sps:$4 sm:$0xff]   ;;  %v1229_v51 = vld [vmem:[%s1367_s29 + $0xb4] ss:$8 sps:$4 sm:$0xff]   ;;  %v247_v55 = vcombine.high %v245_v53, %v245_v53 }
  0x26   : > { %704 = vmatpush1.bf16.msra.mxu0 %v1186_v16  ;;  %664 = vmatprep.subr.bf16.mxu1 %v1187_v17  ;;  %v250_v43 = vunpack.c.0.s8 %v249_v38  ;;  %v1225_v47 = vld [vmem:[%s1367_s29 + $0x1a4] ss:$8 sps:$4 sm:$0xff]   ;;  %v1228_v49 = vld [vmem:[%s1367_s29 + $0x1a0] ss:$8 sps:$4 sm:$0xff]   ;;  %v1231_v52 = vld [vmem:[%s1367_s29 + $0x1b4] ss:$8 sps:$4 sm:$0xff]  }
  0x27   : > { %705 = vmatprep.subr.bf16.mxu0 %v1189_v18  ;;  %v1233_v56 = vld [vmem:[%s1367_s29 + $0xb0] ss:$8 sps:$4 sm:$0xff]   ;;  %v1235_v58 = vld [vmem:[%s1367_s29 + $0xc4] ss:$8 sps:$4 sm:$0xff]   ;;  %v1239_v0 = vld [vmem:[%s1367_s29 + $0xc0] ss:$8 sps:$4 sm:$0xff]  }
  0x28   : > { %v1417_v50 = vsub.s32 %v250_v43, %v1409_v44  ;;  %v1234_v57 = vld [vmem:[%s1367_s29 + $0x1b0] ss:$8 sps:$4 sm:$0xff]   ;;  %v1237_v59 = vld [vmem:[%s1367_s29 + $0x1c4] ss:$8 sps:$4 sm:$0xff]   ;;  %v1240_v1 = vld [vmem:[%s1367_s29 + $0x1c0] ss:$8 sps:$4 sm:$0xff]  }
  0x29   : > { %665 = vmatpush1.bf16.msra.mxu1 %v1191_v19  ;;  %v1241_v2 = vld [vmem:[%s1367_s29 + $0xd4] ss:$8 sps:$4 sm:$0xff]   ;;  %v1245_v5 = vld [vmem:[%s1367_s29 + $0xd0] ss:$8 sps:$4 sm:$0xff]   ;;  %v1247_v7 = vld [vmem:[%s1367_s29 + $0xe4] ss:$8 sps:$4 sm:$0xff]  }
  0x2a   : > { %706 = vmatpush1.bf16.msra.mxu0 %v1192_v20  ;;  %666 = vmatprep.subr.bf16.mxu1 %v1193_v21  ;;  %v254_v54 = vrot.slane %v245_v53, %v1417_v50  ;;  %v261_v61 = vrot.slane %v247_v55, %v1417_v50  ;;  %v1243_v3 = vld [vmem:[%s1367_s29 + $0x1d4] ss:$8 sps:$4 sm:$0xff]   ;;  %v1246_v6 = vld [vmem:[%s1367_s29 + $0x1d0] ss:$8 sps:$4 sm:$0xff]   ;;  %v1249_v8 = vld [vmem:[%s1367_s29 + $0x1e4] ss:$8 sps:$4 sm:$0xff]  }
  0x2b   : > { %707 = vmatprep.subr.bf16.mxu0 %v1195_v22  ;;  %v1251_v9 = vld [vmem:[%s1367_s29 + $0xe0] ss:$8 sps:$4 sm:$0xff]   ;;  %v1253_v11 = vld [vmem:[%s1367_s29 + $0xf4] ss:$8 sps:$4 sm:$0xff]   ;;  %v1257_v13 = vld [vmem:[%s1367_s29 + $0xf0] ss:$8 sps:$4 sm:$0xff]  }
  0x2c   : > { %v262_v60 = vcombine.high %v254_v54, %v254_v54  ;;  %v263_v63 = vcombine.high %v261_v61, %v261_v61  ;;  %v1252_v10 = vld [vmem:[%s1367_s29 + $0x1e0] ss:$8 sps:$4 sm:$0xff]   ;;  %v1255_v12 = vld [vmem:[%s1367_s29 + $0x1f4] ss:$8 sps:$4 sm:$0xff]   ;;  %v1258_v14 = vld [vmem:[%s1367_s29 + $0x1f0] ss:$8 sps:$4 sm:$0xff]   ;;  %v268_v15 = vpack.c.bf16 %v254_v54, %v254_v54  ;;  %v270_v16 = vpack.c.bf16 %v261_v61, %v261_v61 }
  0x2d   : > { %667 = vmatpush1.bf16.msra.mxu1 %v1197_v23  ;;  %p1099_p6 = scmp.ne.s32.totalorder %s1353_s19, 7 }
  0x2e   : > { %708 = vmatpush1.bf16.msra.mxu0 %v1198_v24  ;;  %668 = vmatprep.subr.bf16.mxu1 %v1199_v25  ;;  %v269_v62 = vpack.c.bf16 %v262_v60, %v262_v60  ;;  %v271_v4 = vpack.c.bf16 %v263_v63, %v263_v63  ;;  %v1266_v37 = vld [vmem:[%s1531_s3 + $0x58] sm:$0xff] (!%p1099_p6)   ;;  %v1268_v39 = vld [vmem:[%s1531_s3 + $0x60] sm:$0xff] (!%p1099_p6)   ;;  %v1270_v43 = vld [vmem:[%s1531_s3 + $0x68] sm:$0xff] (!%p1099_p6)   ;;  %vm965_vm0 = vcmask (!%p1099_p6), 74752  }
  0x2f   : > { %709 = vmatprep.subr.bf16.mxu0 %v1201_v26  ;;  %v1267_v38 = vld [vmem:[%s1531_s3 + $0x18] sm:$0xff] (!%p1099_p6)   ;;  %v1273_v53 = vld [vmem:[%s1531_s3 + $0x30] sm:$0xff] (!%p1099_p6)   ;;  %v1100_v63 = vld [vmem:[%s1532_s4] ss:$0 sm:$0xff] (!%p1099_p6) }
  0x30   : > { %688 = vmatprep.mubr.bf16.mxu1 %v269_v62  ;;  %729 = vmatprep.mubr.bf16.mxu0 %v271_v4  ;;  %v1274_v55 = vld [vmem:[%s1531_s3 + $0x78] sm:$0xff] (!%p1099_p6)  }
  0x31   : > { %669 = vmatpush1.bf16.msra.mxu1 %v1203_v27 }
  0x32   : > { %710 = vmatpush1.bf16.msra.mxu0 %v1204_v28  ;;  %670 = vmatprep.subr.bf16.mxu1 %v1205_v29  ;;  %v244_v28 = vld [vmem:[#allocation2] sm:$0xf] }
  0x33   : > { %711 = vmatprep.subr.bf16.mxu0 %v1207_v30 }
  0x35   : > { %671 = vmatpush1.bf16.msra.mxu1 %v1209_v31  ;;  %v1260_v31 = vld [vmem:[%s1531_s3 + $0x40] sm:$0xff] (!%p1099_p6)  }
  0x36   : > { %712 = vmatpush1.bf16.msra.mxu0 %v1210_v32  ;;  %672 = vmatprep.subr.bf16.mxu1 %v1211_v33  ;;  %v1261_v32 = vld [vmem:[%s1531_s3] sm:$0xff] (!%p1099_p6)   ;;  %v1262_v33 = vld [vmem:[%s1531_s3 + $0x48] sm:$0xff] (!%p1099_p6)  }
  0x37   : > { %713 = vmatprep.subr.bf16.mxu0 %v1213_v34  ;;  %v1263_v34 = vld [vmem:[%s1531_s3 + $0x8] sm:$0xff] (!%p1099_p6)  }
  0x39   : > { %673 = vmatpush1.bf16.msra.mxu1 %v1215_v35  ;;  %v1264_v35 = vld [vmem:[%s1531_s3 + $0x50] sm:$0xff] (!%p1099_p6)  }
  0x3a   : > { %714 = vmatpush1.bf16.msra.mxu0 %v1216_v36  ;;  %674 = vmatprep.subr.bf16.mxu1 %v1217_v40  ;;  %v1265_v36 = vld [vmem:[%s1531_s3 + $0x10] sm:$0xff] (!%p1099_p6)   ;;  %v760_v40 = vsub.s32 (!%p1099_p6), 0, %v1409_v44 }
  0x3b   : > { %715 = vmatprep.subr.bf16.mxu0 %v1219_v41  ;;  %v764_v41 = vsub.s32 (!%p1099_p6), 1, %v1409_v44  ;;  %v1271_v44 = vld [vmem:[%s1531_s3 + $0x28] sm:$0xff] (!%p1099_p6)  }
  0x3d   : > { %675 = vmatpush1.bf16.msra.mxu1 %v1221_v42  ;;  %v1269_v42 = vld [vmem:[%s1531_s3 + $0x20] sm:$0xff] (!%p1099_p6)  }
  0x3e   : > { %716 = vmatpush1.bf16.msra.mxu0 %v1222_v45  ;;  %676 = vmatprep.subr.bf16.mxu1 %v1223_v46  ;;  %v756_v45 = vld [vmem:[%s1530_s2] sm:$0x3] (!%p1099_p6) }
  0x3f   : > { %717 = vmatprep.subr.bf16.mxu0 %v1225_v47  ;;  %v761_v46 = vrot.slane (!%p1099_p6), %v756_v45, %v760_v40  ;;  %v765_v47 = vrot.slane (!%p1099_p6), %v756_v45, %v764_v41 }
  0x41   : > { %677 = vmatpush1.bf16.msra.mxu1 %v1227_v48  ;;  %v766_v48 = vcombine.low (!%p1099_p6), %v761_v46, %v765_v47 }
  0x42   : > { %718 = vmatpush1.bf16.msra.mxu0 %v1228_v49  ;;  %678 = vmatprep.subr.bf16.mxu1 %v1229_v51  ;;  %v1272_v49 = vld [vmem:[%s1531_s3 + $0x70] sm:$0xff] (!%p1099_p6)  }
  0x43   : > { %719 = vmatprep.subr.bf16.mxu0 %v1231_v52  ;;  %v773_v52 = vrot.slane (!%p1099_p6), %v766_v48, %v1417_v50 }
  0x45   : > { %679 = vmatpush1.bf16.msra.mxu1 %v1233_v56 }
  0x46   : > { %720 = vmatpush1.bf16.msra.mxu0 %v1234_v57  ;;  %680 = vmatprep.subr.bf16.mxu1 %v1235_v58  ;;  %v1275_v57 = vld [vmem:[%s1531_s3 + $0x38] sm:$0xff] (!%p1099_p6)  }
  0x47   : > { %721 = vmatprep.subr.bf16.mxu0 %v1237_v59 }
  0x49   : > { %681 = vmatpush1.bf16.msra.mxu1 %v1239_v0 }
  0x4a   : > { %722 = vmatpush1.bf16.msra.mxu0 %v1240_v1  ;;  %682 = vmatprep.subr.bf16.mxu1 %v1241_v2 }
  0x4b   : > { %723 = vmatprep.subr.bf16.mxu0 %v1243_v3 }
  0x4d   : > { %683 = vmatpush1.bf16.msra.mxu1 %v1245_v5 }
  0x4e   : > { %724 = vmatpush1.bf16.msra.mxu0 %v1246_v6  ;;  %684 = vmatprep.subr.bf16.mxu1 %v1247_v7 }
  0x4f   : > { %725 = vmatprep.subr.bf16.mxu0 %v1249_v8 }
  0x51   : > { %685 = vmatpush1.bf16.msra.mxu1 %v1251_v9 }
  0x52   : > { %726 = vmatpush1.bf16.msra.mxu0 %v1252_v10  ;;  %686 = vmatprep.subr.bf16.mxu1 %v1253_v11 }
  0x53   : > { %727 = vmatprep.subr.bf16.mxu0 %v1255_v12 }
  0x55   : > { %687 = vmatpush1.bf16.msra.mxu1 %v1257_v13 }
  0x56   : > { %728 = vmatpush1.bf16.msra.mxu0 %v1258_v14 }
  0x57   : > { %1122 = vmatprep.subr.bf16.mxu0 (!%p1099_p6), %v1260_v31 }
  0x58   : > { %689 = vmatmul.mubr.bf16.vlgmr.msra.gmra.mrb[0].mxu1 %v268_v15 }
  0x59   : > { %730 = vmatmul.mubr.bf16.vlgmr.msra.gmra.mrb[0].mxu0 %v270_v16 }
  0x5a   : > { %1123 = vmatpush3.bf16.msra.mxu0 (!%p1099_p6), %v1261_v32 }
  0x5b   : > { %1124 = vmatprep.subr.bf16.mxu0 (!%p1099_p6), %v1262_v33 }
  0x5e   : > { %1125 = vmatpush3.bf16.msra.mxu0 (!%p1099_p6), %v1263_v34 }
  0x5f   : > { %1126 = vmatprep.subr.bf16.mxu0 (!%p1099_p6), %v1264_v35 }
  0x62   : > { %1127 = vmatpush3.bf16.msra.mxu0 (!%p1099_p6), %v1265_v36 }
  0x63   : > { %1128 = vmatprep.subr.bf16.mxu0 (!%p1099_p6), %v1266_v37 }
  0x66   : > { %1129 = vmatpush3.bf16.msra.mxu0 (!%p1099_p6), %v1267_v38 }
  0x67   : > { %1130 = vmatprep.subr.bf16.mxu0 (!%p1099_p6), %v1268_v39 }
  0x6a   : > { %1131 = vmatpush3.bf16.msra.mxu0 (!%p1099_p6), %v1269_v42 }
  0x6b   : > { %1132 = vmatprep.subr.bf16.mxu0 (!%p1099_p6), %v1270_v43 }
  0x6e   : > { %1133 = vmatpush3.bf16.msra.mxu0 (!%p1099_p6), %v1271_v44 }
  0x6f   : > { %1134 = vmatprep.subr.bf16.mxu0 (!%p1099_p6), %v1272_v49 }
  0x72   : > { %1135 = vmatpush3.bf16.msra.mxu0 (!%p1099_p6), %v1273_v53 }
  0x73   : > { %1136 = vmatprep.subr.bf16.mxu0 (!%p1099_p6), %v1274_v55 }
  0x76   : > { %1137 = vmatpush3.bf16.msra.mxu0 (!%p1099_p6), %v1275_v57 }
 0x12b   : > { %v690_v17 = vpop.f32.mrb[0].mxu1 }
 0x12c   : > { %v731_v18 = vpop.f32.mrb[0].mxu0  ;;  %v692_v20 = vpop.f32.mrb[1].mxu1 }
 0x12d   : > { %v732_v19 = vadd.f32 %v731_v18, %v690_v17  ;;  %v733_v21 = vpop.f32.mrb[1].mxu0  ;;  %v694_v23 = vpop.f32.mrb[2].mxu1 }
 0x12e   : > { %v734_v22 = vadd.f32 %v733_v21, %v692_v20  ;;  %v735_v24 = vpop.f32.mrb[2].mxu0  ;;  %v695_v25 = vpop.f32.mrb[3].mxu1 }
 0x12f   : > { %v736_v26 = vpop.f32.mrb[3].mxu0 }
 0x130   : > { %v740_v27 = vcombine.low %v732_v19, %v734_v22  ;;  %754 = sbr.rel (%p1099_p6) target bundleno = 547 (0x223), region = 48 }
 0x132   : > { %v747_v29 = vrot.slane %v740_v27, %v1417_v50 }
 0x134   : > { %v749_v30 = vadd.f32 %v747_v29, %v244_v28 }
 0x136   : > { %750 = vst [vmem:[#allocation2] sm:$0xf] %v749_v30 }
 0x13d   : > { %v755_v51 = vld [vmem:[#allocation2] sm:$0xf] }
 0x13e   : > { %v775_v54 = vadd.f32 %v773_v52, %v755_v51 }
 0x140   : > { %v776_v56 = vmax.f32 %v775_v54, 0.0 }
 0x142   : > { %v784_v58 = vrot.slane %v776_v56, %v1417_v50 }
 0x144   : > { %v785_v59 = vcombine.high %v784_v58, %v784_v58  ;;  %v788_v60 = vpack.c.bf16 %v784_v58, %v784_v58 }
 0x146   : > { %v789_v61 = vpack.c.bf16 %v785_v59, %v785_v59 }
 0x148   : > { %957 = vmatprep.mubr.bf16.mxu0 %v789_v61 }
 0x149   : > { %958 = vmatmul.mubr.bf16.vlgmr.msra.gmra.mrb[0].mxu0 %v788_v60 }
 0x21c   : > { %v1138_v62 = vpop.f32.mrb[0].mxu0 }
 0x21d   : > { %v1139_v0 = vpop.f32.mrb[1].mxu0 }
 0x21e   : > { %v1140_v1 = vadd.f32 %v1139_v0, %v1138_v62  ;;  %v1141_v2 = vpop.f32.mrb[2].mxu0 }
 0x21f   : > { %v1142_v3 = vpop.f32.mrb[3].mxu0 }
 0x220   : > { %v960_v4 = vadd.f32 %v1140_v1, %v1100_v63 }
 0x222   : > { %966 = vst.msk [vmem:[#allocation3] sm:$0x3] %vm965_vm0, %v960_v4 }
 0x223 PF: > { %p1150_p7 = scmp.eq.s32.totalorder %s1353_s19, 7  ;;  %s1316_s20 = smov [#allocation3]  }
 0x224   : > { %s974_s21 = sshll.u32 %s1316_s20, 4  ;;  %s975_s21 = int_to_ptr.vmem [resolvable:$true] %s974_s21 }
 0x225   : > { %s1276_s22 = scalar_lea.vmem %s975_s21, 32  ;;  %p1283_p11 = scmp.lt.s32.totalorder %s975_s21, %s975_s21 }
 0x226   : > { %p1277_p8 = scmp.ne.s32.totalorder %s975_s21, %s1276_s22  ;;  %p1284_p12 = scmp.lt.s32.totalorder %s1276_s22, %s1276_s22 }
 0x228   : > { %p1278_p9 = pnand %p1277_p8, %p1150_p7  ;;  %p1285_p13 = por %p1284_p12, %p1283_p11 }
 0x22a   : > { %p1279_p10 = pneg %p1278_p9 }
 0x22c   : > { %p1286_p0 = pnand %p1285_p13, %p1279_p10 }
 0x22e   : > { %1289 = shalt.err (!%p1286_p0)
}
 0x22f   : > { %s1290_s25 = scalar_lea.hbm %s1533_s5, 32 }
 0x230   : > { %p1291_p1 = scmp.ne.s32.totalorder %s1533_s5, %s1290_s25  ;;  %p1296_p4 = scmp.lt.u32.totalorder %s1290_s25, %s1533_s5 }
 0x232   : > { %p1292_p2 = pnand %p1291_p1, %p1150_p7 }
 0x234   : > { %p1293_p3 = pneg %p1292_p2 }
 0x236   : > { %p1298_p5 = pnand %p1296_p4, %p1293_p3 }
 0x238   : > { %1301 = shalt.err (!%p1298_p5)
}
 0x239   : > { %1147 = dma.vmem_to_hbm [thread:$0]  (%p1150_p7), %s975_s21, 32, %s1533_s5, [#allocation4]  }
 0x23a   : > { %1307 = dma.done.wait (%p1150_p7), [#allocation4], 32  }
 0x23b   : > { %1309 = vsyncadd (%p1150_p7), [#allocation4], 4294967264 }
 0x23c PF: > { %s16_s18 = sadd.s32 1, %s1312_s18  }
 0x23d   : > { %p13_p6 = scmp.ge.s32.totalorder %s16_s18, 10  }
 0x23f   :  { %15 = sbr.rel (!%p13_p6) target bundleno = 1 (0x1), region = 78 }
 0x246   :  { %987 = vsyncpa [#allocation4], 1 }
 0x247   :  { %989 = vsyncpa [#allocation4 + $0x1], 1 }

</bundles_post_ra>
